<compile_context>
chip_gen: v7x
topology: tpu7x:2x2x1
jax: 0.10.0
libtpu: 0.0.40
codegen_flags: <defaults>
</compile_context>

<pallas_src>
import jax
import jax.numpy as jnp
from jax import lax
from jax.experimental import pallas as pl
from jax.experimental.pallas import tpu as pltpu


_LANE_GROUP = 128      # output lanes handled per selection matmul
_UNROLL_ROWS = 16      # fully unroll the row loop up to this many output rows
_FORI_UNROLL = 4       # unroll factor of the fori_loop row loop


def _make_maxpool_kernel(s, th, w_out, w_in, precision, use_roll):
    """Kernel over one block: x_ref (bc, th*s, w_in) -> o_ref (bc, th, w_out)."""
    gl = _LANE_GROUP
    n_full = w_out // gl                # full 128-wide output lane groups
    tail = w_out - n_full * gl          # ragged last group (0..127 columns)
    taps = 1 if use_roll else s         # column taps left after pre-reduction

    def kernel(x_ref, o_ref):
        dt = x_ref.dtype

        # 0/1 selection matrices, hoisted out of the row loop.
        #   sel_c[w, j] = 1  iff  w == j*s + c
        # Block-diagonal structure: one (gl*s, gl) matrix serves every full
        # 128-lane output group; the ragged tail group gets its own.
        def sel_mat(in_w, c):
            wi = lax.broadcasted_iota(jnp.int32, (in_w, gl), 0)
            ji = lax.broadcasted_iota(jnp.int32, (in_w, gl), 1)
            return (wi == ji * s + c).astype(dt)

        sels_full = [sel_mat(gl * s, c) for c in range(taps)] if n_full else []
        sels_tail = [sel_mat(tail * s, c) for c in range(taps)] if tail else []

        def compact(mg, sels):
            # Compact lanes j*s (+c) -> lane j on the otherwise-idle MXU.
            acc = None
            for c in range(taps):
                t = jnp.dot(mg, sels[c],
                            preferred_element_type=jnp.float32,
                            precision=precision)
                acc = t if acc is None else jnp.maximum(acc, t)
            return acc

        def load_row(idx):
            if isinstance(idx, int):                        # static row index
                return x_ref[:, idx, :]
            return x_ref[:, pl.ds(idx, 1), :][:, 0, :]      # dynamic sublane load

        def one_row(ho, row0):
            # --- row taps: elementwise max over the s input rows (VPU) ---
            m = load_row(row0)
            for r in range(1, s):
                m = jnp.maximum(m, load_row(row0 + r))

            # --- optional XLU pre-reduction of the s column taps (cuts the
            #     MXU selection matmuls from s to 1) ---
            if use_roll:
                mm = m
                for c in range(1, s):
                    mm = jnp.maximum(mm, pltpu.roll(m, shift=w_in - c, axis=-1))
                m = mm

            def store(col0, width, val):                    # val: (bc, width)
                v = val.astype(o_ref.dtype)
                if isinstance(ho, int):
                    o_ref[:, ho, pl.ds(col0, width)] = v
                else:
                    o_ref[:, pl.ds(ho, 1), pl.ds(col0, width)] = v[:, None, :]

            # --- column compaction, one 128-output-lane group at a time ---
            for g in range(n_full):
                mg = m[:, g * gl * s:(g + 1) * gl * s]
                store(g * gl, gl, compact(mg, sels_full))
            if tail:
                mg = m[:, n_full * gl * s:]
                store(n_full * gl, tail, compact(mg, sels_tail)[:, :tail])

        if th <= _UNROLL_ROWS:
            for ho in range(th):                             # static indices
                one_row(ho, ho * s)
        else:
            def body(ho, carry):
                one_row(ho, pl.multiple_of(ho * s, s))
                return carry
            lax.fori_loop(0, th, body, 0, unroll=_FORI_UNROLL)

    return kernel


def _choose_tiling(nc, h_out, w_out, s, itemsize):
    """Pick channel block bc, output-row block th, grid, and VMEM limit."""
    sub = {4: 8, 2: 16, 1: 32}.get(itemsize, 8)      # sublane packing
    w_in = w_out * s
    row_bytes = w_in * itemsize
    target_blk = 8 * 1024 * 1024                     # ~8 MiB of input per step
    rowset_budget = 64 * 1024                        # per-row vreg working set

    # Channel block: sublane multiple, <=128, bounded by per-row working set.
    bc = (rowset_budget // max(row_bytes, 1)) // sub * sub
    bc = max(sub, min(128, bc))
    bc = min(bc, pl.cdiv(nc, sub) * sub)
    if bc > nc:
        bc = nc                                      # few channels: take all

    # Output-row block: fill the byte target; multiple of 8 unless full height.
    th = target_blk // max(bc * s * row_bytes, 1)
    if th >= h_out:
        th = h_out
    else:
        th = min(max(8, (th // 8) * 8), h_out)

    n_cb = pl.cdiv(nc, bc)
    n_hb = pl.cdiv(h_out, th)
    # Keep >= 2 grid steps when possible so the "parallel" axes can shard
    # across TensorCores (v7x megacore).
    if n_cb * n_hb < 2 and bc >= 2 * sub:
        bc = max(sub, ((bc // 2) // sub) * sub)
        n_cb = pl.cdiv(nc, bc)

    in_blk = bc * th * s * row_bytes
    out_blk = bc * th * w_out * itemsize
    vmem_limit = int(min(48 * 1024 * 1024,
                         max(32 * 1024 * 1024,
                             2 * (in_blk + out_blk) + (4 << 20))))
    return bc, th, n_cb, n_hb, vmem_limit


def downsample(x, scale_factor):
    """Equivalent of nn.MaxPool2d(kernel_size=s, stride=s) on NCHW input."""
    n, c, h, w = x.shape
    s = int(scale_factor)
    if s == 1:
        return x
    h_out, w_out = h // s, w // s                    # floor semantics
    if h_out == 0 or w_out == 0:
        return jnp.zeros((n, c, h_out, w_out), x.dtype)
    if h != h_out * s or w != w_out * s:             # torch drops partial windows
        x = x[:, :, :h_out * s, :w_out * s]
        h, w = h_out * s, w_out * s

    nc = n * c
    x3 = x.reshape(nc, h, w)                         # leading-dim merge: free

    itemsize = x.dtype.itemsize
    bc, th, n_cb, n_hb, vmem_limit = _choose_tiling(nc, h_out, w_out, s, itemsize)

    use_roll = (w % 128 == 0)                        # whole-vreg lane rotates only
    precision = (lax.Precision.HIGHEST
                 if x.dtype == jnp.float32 else lax.Precision.DEFAULT)

    kernel = _make_maxpool_kernel(s, th, w_out, w, precision, use_roll)

    out3 = pl.pallas_call(
        kernel,
        out_shape=jax.ShapeDtypeStruct((nc, h_out, w_out), x.dtype),
        grid=(n_cb, n_hb),
        in_specs=[pl.BlockSpec((bc, th * s, w), lambda i, j: (i, j, 0))],
        out_specs=pl.BlockSpec((bc, th, w_out), lambda i, j: (i, j, 0)),
        compiler_params=pltpu.CompilerParams(
            dimension_semantics=("parallel", "parallel"),
            vmem_limit_bytes=vmem_limit,
        ),
    )(x3)
    return out3.reshape(n, c, h_out, w_out)          # leading-dim split: free


if __name__ == "__main__":
    def ref_pool(x, s):
        n, c, h, w = x.shape
        return x[:, :, :h // s * s, :w // s * s].reshape(
            n, c, h // s, s, w // s, s).max(axis=(3, 5))

    downsample_jit = jax.jit(downsample, static_argnums=(1,))

    # Primary (spec-sized) case: N=2, C=4, 16x16, scale 2, float32.
    key = jax.random.PRNGKey(0)
    x = jax.random.normal(key, (2, 4, 16, 16), dtype=jnp.float32)
    y = jax.block_until_ready(downsample_jit(x, 2))
    assert y.shape == (2, 4, 8, 8) and y.dtype == x.dtype
    assert jnp.allclose(y, ref_pool(x, 2)), "f32 s=2 mismatch"

    # bf16, scale 4, channel count not a multiple of the sublane packing.
    xb = jax.random.normal(jax.random.PRNGKey(1), (2, 3, 16, 16),
                           dtype=jnp.bfloat16)
    yb = jax.block_until_ready(downsample_jit(xb, 4))
    assert yb.shape == (2, 3, 4, 4) and yb.dtype == xb.dtype
    assert jnp.allclose(yb.astype(jnp.float32),
                        ref_pool(xb, 4).astype(jnp.float32)), "bf16 s=4 mismatch"

    # Taller image: exercises the fori_loop row path (rows-per-block > 16).
    xt = jax.random.normal(jax.random.PRNGKey(2), (2, 5, 128, 16),
                           dtype=jnp.float32)
    yt = jax.block_until_ready(downsample_jit(xt, 2))
    assert yt.shape == (2, 5, 64, 8) and yt.dtype == xt.dtype
    assert jnp.allclose(yt, ref_pool(xt, 2)), "f32 tall-image mismatch"

    print("KERNEL_OK")
</pallas_src>

<mosaic_0001>
module attributes {stable_mosaic.version = 11 : i64} {
  func.func @kernel(%arg0: i32, %arg1: i32, %arg2: memref<8x16x16xf32, #tpu.memory_space<vmem>>, %arg3: memref<8x8x8xf32, #tpu.memory_space<vmem>>) attributes {dimension_semantics = [#tpu.dimension_semantics<parallel>, #tpu.dimension_semantics<parallel>], iteration_bounds = array<i64: 1, 1>, scalar_prefetch = 0 : i64, scratch_operands = 0 : i64, tpu.core_type = #tpu.core_type<tc>, window_params = [{transform_indices = @transform_0, window_bounds = array<i64: 8, 16, 16>}, {transform_indices = @transform_1, window_bounds = array<i64: 8, 8, 8>}]} {
    %0 = tpu.iota {dimensions = array<i32: 0>} : vector<16x128xi32>
    %1 = tpu.iota {dimensions = array<i32: 1>} : vector<16x128xi32>
    %c2_i32 = arith.constant 2 : i32
    %2 = vector.broadcast %c2_i32 : i32 to vector<16x128xi32>
    %3 = arith.muli %1, %2 : vector<16x128xi32>
    %c0_i32 = arith.constant 0 : i32
    %4 = vector.broadcast %c0_i32 : i32 to vector<16x128xi32>
    %5 = arith.addi %3, %4 : vector<16x128xi32>
    %6 = arith.cmpi eq, %0, %5 : vector<16x128xi32>
    %7 = arith.extui %6 : vector<16x128xi1> to vector<16x128xi32>
    %8 = arith.sitofp %7 : vector<16x128xi32> to vector<16x128xf32>
    %9 = tpu.iota {dimensions = array<i32: 0>} : vector<16x128xi32>
    %10 = tpu.iota {dimensions = array<i32: 1>} : vector<16x128xi32>
    %c2_i32_0 = arith.constant 2 : i32
    %11 = vector.broadcast %c2_i32_0 : i32 to vector<16x128xi32>
    %12 = arith.muli %10, %11 : vector<16x128xi32>
    %c1_i32 = arith.constant 1 : i32
    %13 = vector.broadcast %c1_i32 : i32 to vector<16x128xi32>
    %14 = arith.addi %12, %13 : vector<16x128xi32>
    %15 = arith.cmpi eq, %9, %14 : vector<16x128xi32>
    %16 = arith.extui %15 : vector<16x128xi1> to vector<16x128xi32>
    %17 = arith.sitofp %16 : vector<16x128xi32> to vector<16x128xf32>
    %c0 = arith.constant 0 : index
    %c0_1 = arith.constant 0 : index
    %c0_2 = arith.constant 0 : index
    %18 = vector.load %arg2[%c0, %c0_1, %c0_2] : memref<8x16x16xf32, #tpu.memory_space<vmem>>, vector<8x1x16xf32>
    %19 = vector.shape_cast %18 : vector<8x1x16xf32> to vector<8x16xf32>
    %c0_3 = arith.constant 0 : index
    %c1 = arith.constant 1 : index
    %c0_4 = arith.constant 0 : index
    %20 = vector.load %arg2[%c0_3, %c1, %c0_4] : memref<8x16x16xf32, #tpu.memory_space<vmem>>, vector<8x1x16xf32>
    %21 = vector.shape_cast %20 : vector<8x1x16xf32> to vector<8x16xf32>
    %22 = arith.maximumf %19, %21 : vector<8x16xf32>
    %cst = arith.constant dense<0.000000e+00> : vector<8x128xf32>
    %23 = tpu.matmul %22, %8, %cst {dimension_numbers = #tpu.dot_dimension_numbers<[1], [0], [0], [1], [0, 0, 1, 1], [], []>, precision = #tpu.contract_precision<fp32>} : vector<8x16xf32>, vector<16x128xf32>, vector<8x128xf32> -> vector<8x128xf32>
    %cst_5 = arith.constant dense<0.000000e+00> : vector<8x128xf32>
    %24 = tpu.matmul %22, %17, %cst_5 {dimension_numbers = #tpu.dot_dimension_numbers<[1], [0], [0], [1], [0, 0, 1, 1], [], []>, precision = #tpu.contract_precision<fp32>} : vector<8x16xf32>, vector<16x128xf32>, vector<8x128xf32> -> vector<8x128xf32>
    %25 = arith.maximumf %23, %24 : vector<8x128xf32>
    %26 = vector.extract_strided_slice %25 {offsets = [0, 0], sizes = [8, 8], strides = [1, 1]} : vector<8x128xf32> to vector<8x8xf32>
    %c0_6 = arith.constant 0 : index
    %c0_7 = arith.constant 0 : index
    %c0_8 = arith.constant 0 : index
    %27 = vector.load %arg3[%c0_6, %c0_7, %c0_8] : memref<8x8x8xf32, #tpu.memory_space<vmem>>, vector<8x1x8xf32>
    %28 = vector.shape_cast %27 : vector<8x1x8xf32> to vector<8x8xf32>
    %29 = vector.shape_cast %26 : vector<8x8xf32> to vector<8x1x8xf32>
    tpu.vector_store %arg3[%c0_6, %c0_7, %c0_8], %29 {strides = array<i32>} : memref<8x8x8xf32, #tpu.memory_space<vmem>>, vector<8x1x8xf32>,
    %c0_9 = arith.constant 0 : index
    %c2 = arith.constant 2 : index
    %c0_10 = arith.constant 0 : index
    %30 = vector.load %arg2[%c0_9, %c2, %c0_10] : memref<8x16x16xf32, #tpu.memory_space<vmem>>, vector<8x1x16xf32>
    %31 = vector.shape_cast %30 : vector<8x1x16xf32> to vector<8x16xf32>
    %c0_11 = arith.constant 0 : index
    %c3 = arith.constant 3 : index
    %c0_12 = arith.constant 0 : index
    %32 = vector.load %arg2[%c0_11, %c3, %c0_12] : memref<8x16x16xf32, #tpu.memory_space<vmem>>, vector<8x1x16xf32>
    %33 = vector.shape_cast %32 : vector<8x1x16xf32> to vector<8x16xf32>
    %34 = arith.maximumf %31, %33 : vector<8x16xf32>
    %cst_13 = arith.constant dense<0.000000e+00> : vector<8x128xf32>
    %35 = tpu.matmul %34, %8, %cst_13 {dimension_numbers = #tpu.dot_dimension_numbers<[1], [0], [0], [1], [0, 0, 1, 1], [], []>, precision = #tpu.contract_precision<fp32>} : vector<8x16xf32>, vector<16x128xf32>, vector<8x128xf32> -> vector<8x128xf32>
    %cst_14 = arith.constant dense<0.000000e+00> : vector<8x128xf32>
    %36 = tpu.matmul %34, %17, %cst_14 {dimension_numbers = #tpu.dot_dimension_numbers<[1], [0], [0], [1], [0, 0, 1, 1], [], []>, precision = #tpu.contract_precision<fp32>} : vector<8x16xf32>, vector<16x128xf32>, vector<8x128xf32> -> vector<8x128xf32>
    %37 = arith.maximumf %35, %36 : vector<8x128xf32>
    %38 = vector.extract_strided_slice %37 {offsets = [0, 0], sizes = [8, 8], strides = [1, 1]} : vector<8x128xf32> to vector<8x8xf32>
    %c0_15 = arith.constant 0 : index
    %c1_16 = arith.constant 1 : index
    %c0_17 = arith.constant 0 : index
    %39 = vector.load %arg3[%c0_15, %c1_16, %c0_17] : memref<8x8x8xf32, #tpu.memory_space<vmem>>, vector<8x1x8xf32>
    %40 = vector.shape_cast %39 : vector<8x1x8xf32> to vector<8x8xf32>
    %41 = vector.shape_cast %38 : vector<8x8xf32> to vector<8x1x8xf32>
    tpu.vector_store %arg3[%c0_15, %c1_16, %c0_17], %41 {strides = array<i32>} : memref<8x8x8xf32, #tpu.memory_space<vmem>>, vector<8x1x8xf32>,
    %c0_18 = arith.constant 0 : index
    %c4 = arith.constant 4 : index
    %c0_19 = arith.constant 0 : index
    %42 = vector.load %arg2[%c0_18, %c4, %c0_19] : memref<8x16x16xf32, #tpu.memory_space<vmem>>, vector<8x1x16xf32>
    %43 = vector.shape_cast %42 : vector<8x1x16xf32> to vector<8x16xf32>
    %c0_20 = arith.constant 0 : index
    %c5 = arith.constant 5 : index
    %c0_21 = arith.constant 0 : index
    %44 = vector.load %arg2[%c0_20, %c5, %c0_21] : memref<8x16x16xf32, #tpu.memory_space<vmem>>, vector<8x1x16xf32>
    %45 = vector.shape_cast %44 : vector<8x1x16xf32> to vector<8x16xf32>
    %46 = arith.maximumf %43, %45 : vector<8x16xf32>
    %cst_22 = arith.constant dense<0.000000e+00> : vector<8x128xf32>
    %47 = tpu.matmul %46, %8, %cst_22 {dimension_numbers = #tpu.dot_dimension_numbers<[1], [0], [0], [1], [0, 0, 1, 1], [], []>, precision = #tpu.contract_precision<fp32>} : vector<8x16xf32>, vector<16x128xf32>, vector<8x128xf32> -> vector<8x128xf32>
    %cst_23 = arith.constant dense<0.000000e+00> : vector<8x128xf32>
    %48 = tpu.matmul %46, %17, %cst_23 {dimension_numbers = #tpu.dot_dimension_numbers<[1], [0], [0], [1], [0, 0, 1, 1], [], []>, precision = #tpu.contract_precision<fp32>} : vector<8x16xf32>, vector<16x128xf32>, vector<8x128xf32> -> vector<8x128xf32>
    %49 = arith.maximumf %47, %48 : vector<8x128xf32>
    %50 = vector.extract_strided_slice %49 {offsets = [0, 0], sizes = [8, 8], strides = [1, 1]} : vector<8x128xf32> to vector<8x8xf32>
    %c0_24 = arith.constant 0 : index
    %c2_25 = arith.constant 2 : index
    %c0_26 = arith.constant 0 : index
    %51 = vector.load %arg3[%c0_24, %c2_25, %c0_26] : memref<8x8x8xf32, #tpu.memory_space<vmem>>, vector<8x1x8xf32>
    %52 = vector.shape_cast %51 : vector<8x1x8xf32> to vector<8x8xf32>
    %53 = vector.shape_cast %50 : vector<8x8xf32> to vector<8x1x8xf32>
    tpu.vector_store %arg3[%c0_24, %c2_25, %c0_26], %53 {strides = array<i32>} : memref<8x8x8xf32, #tpu.memory_space<vmem>>, vector<8x1x8xf32>,
    %c0_27 = arith.constant 0 : index
    %c6 = arith.constant 6 : index
    %c0_28 = arith.constant 0 : index
    %54 = vector.load %arg2[%c0_27, %c6, %c0_28] : memref<8x16x16xf32, #tpu.memory_space<vmem>>, vector<8x1x16xf32>
    %55 = vector.shape_cast %54 : vector<8x1x16xf32> to vector<8x16xf32>
    %c0_29 = arith.constant 0 : index
    %c7 = arith.constant 7 : index
    %c0_30 = arith.constant 0 : index
    %56 = vector.load %arg2[%c0_29, %c7, %c0_30] : memref<8x16x16xf32, #tpu.memory_space<vmem>>, vector<8x1x16xf32>
    %57 = vector.shape_cast %56 : vector<8x1x16xf32> to vector<8x16xf32>
    %58 = arith.maximumf %55, %57 : vector<8x16xf32>
    %cst_31 = arith.constant dense<0.000000e+00> : vector<8x128xf32>
    %59 = tpu.matmul %58, %8, %cst_31 {dimension_numbers = #tpu.dot_dimension_numbers<[1], [0], [0], [1], [0, 0, 1, 1], [], []>, precision = #tpu.contract_precision<fp32>} : vector<8x16xf32>, vector<16x128xf32>, vector<8x128xf32> -> vector<8x128xf32>
    %cst_32 = arith.constant dense<0.000000e+00> : vector<8x128xf32>
    %60 = tpu.matmul %58, %17, %cst_32 {dimension_numbers = #tpu.dot_dimension_numbers<[1], [0], [0], [1], [0, 0, 1, 1], [], []>, precision = #tpu.contract_precision<fp32>} : vector<8x16xf32>, vector<16x128xf32>, vector<8x128xf32> -> vector<8x128xf32>
    %61 = arith.maximumf %59, %60 : vector<8x128xf32>
    %62 = vector.extract_strided_slice %61 {offsets = [0, 0], sizes = [8, 8], strides = [1, 1]} : vector<8x128xf32> to vector<8x8xf32>
    %c0_33 = arith.constant 0 : index
    %c3_34 = arith.constant 3 : index
    %c0_35 = arith.constant 0 : index
    %63 = vector.load %arg3[%c0_33, %c3_34, %c0_35] : memref<8x8x8xf32, #tpu.memory_space<vmem>>, vector<8x1x8xf32>
    %64 = vector.shape_cast %63 : vector<8x1x8xf32> to vector<8x8xf32>
    %65 = vector.shape_cast %62 : vector<8x8xf32> to vector<8x1x8xf32>
    tpu.vector_store %arg3[%c0_33, %c3_34, %c0_35], %65 {strides = array<i32>} : memref<8x8x8xf32, #tpu.memory_space<vmem>>, vector<8x1x8xf32>,
    %c0_36 = arith.constant 0 : index
    %c8 = arith.constant 8 : index
    %c0_37 = arith.constant 0 : index
    %66 = vector.load %arg2[%c0_36, %c8, %c0_37] : memref<8x16x16xf32, #tpu.memory_space<vmem>>, vector<8x1x16xf32>
    %67 = vector.shape_cast %66 : vector<8x1x16xf32> to vector<8x16xf32>
    %c0_38 = arith.constant 0 : index
    %c9 = arith.constant 9 : index
    %c0_39 = arith.constant 0 : index
    %68 = vector.load %arg2[%c0_38, %c9, %c0_39] : memref<8x16x16xf32, #tpu.memory_space<vmem>>, vector<8x1x16xf32>
    %69 = vector.shape_cast %68 : vector<8x1x16xf32> to vector<8x16xf32>
    %70 = arith.maximumf %67, %69 : vector<8x16xf32>
    %cst_40 = arith.constant dense<0.000000e+00> : vector<8x128xf32>
    %71 = tpu.matmul %70, %8, %cst_40 {dimension_numbers = #tpu.dot_dimension_numbers<[1], [0], [0], [1], [0, 0, 1, 1], [], []>, precision = #tpu.contract_precision<fp32>} : vector<8x16xf32>, vector<16x128xf32>, vector<8x128xf32> -> vector<8x128xf32>
    %cst_41 = arith.constant dense<0.000000e+00> : vector<8x128xf32>
    %72 = tpu.matmul %70, %17, %cst_41 {dimension_numbers = #tpu.dot_dimension_numbers<[1], [0], [0], [1], [0, 0, 1, 1], [], []>, precision = #tpu.contract_precision<fp32>} : vector<8x16xf32>, vector<16x128xf32>, vector<8x128xf32> -> vector<8x128xf32>
    %73 = arith.maximumf %71, %72 : vector<8x128xf32>
    %74 = vector.extract_strided_slice %73 {offsets = [0, 0], sizes = [8, 8], strides = [1, 1]} : vector<8x128xf32> to vector<8x8xf32>
    %c0_42 = arith.constant 0 : index
    %c4_43 = arith.constant 4 : index
    %c0_44 = arith.constant 0 : index
    %75 = vector.load %arg3[%c0_42, %c4_43, %c0_44] : memref<8x8x8xf32, #tpu.memory_space<vmem>>, vector<8x1x8xf32>
    %76 = vector.shape_cast %75 : vector<8x1x8xf32> to vector<8x8xf32>
    %77 = vector.shape_cast %74 : vector<8x8xf32> to vector<8x1x8xf32>
    tpu.vector_store %arg3[%c0_42, %c4_43, %c0_44], %77 {strides = array<i32>} : memref<8x8x8xf32, #tpu.memory_space<vmem>>, vector<8x1x8xf32>,
    %c0_45 = arith.constant 0 : index
    %c10 = arith.constant 10 : index
    %c0_46 = arith.constant 0 : index
    %78 = vector.load %arg2[%c0_45, %c10, %c0_46] : memref<8x16x16xf32, #tpu.memory_space<vmem>>, vector<8x1x16xf32>
    %79 = vector.shape_cast %78 : vector<8x1x16xf32> to vector<8x16xf32>
    %c0_47 = arith.constant 0 : index
    %c11 = arith.constant 11 : index
    %c0_48 = arith.constant 0 : index
    %80 = vector.load %arg2[%c0_47, %c11, %c0_48] : memref<8x16x16xf32, #tpu.memory_space<vmem>>, vector<8x1x16xf32>
    %81 = vector.shape_cast %80 : vector<8x1x16xf32> to vector<8x16xf32>
    %82 = arith.maximumf %79, %81 : vector<8x16xf32>
    %cst_49 = arith.constant dense<0.000000e+00> : vector<8x128xf32>
    %83 = tpu.matmul %82, %8, %cst_49 {dimension_numbers = #tpu.dot_dimension_numbers<[1], [0], [0], [1], [0, 0, 1, 1], [], []>, precision = #tpu.contract_precision<fp32>} : vector<8x16xf32>, vector<16x128xf32>, vector<8x128xf32> -> vector<8x128xf32>
    %cst_50 = arith.constant dense<0.000000e+00> : vector<8x128xf32>
    %84 = tpu.matmul %82, %17, %cst_50 {dimension_numbers = #tpu.dot_dimension_numbers<[1], [0], [0], [1], [0, 0, 1, 1], [], []>, precision = #tpu.contract_precision<fp32>} : vector<8x16xf32>, vector<16x128xf32>, vector<8x128xf32> -> vector<8x128xf32>
    %85 = arith.maximumf %83, %84 : vector<8x128xf32>
    %86 = vector.extract_strided_slice %85 {offsets = [0, 0], sizes = [8, 8], strides = [1, 1]} : vector<8x128xf32> to vector<8x8xf32>
    %c0_51 = arith.constant 0 : index
    %c5_52 = arith.constant 5 : index
    %c0_53 = arith.constant 0 : index
    %87 = vector.load %arg3[%c0_51, %c5_52, %c0_53] : memref<8x8x8xf32, #tpu.memory_space<vmem>>, vector<8x1x8xf32>
    %88 = vector.shape_cast %87 : vector<8x1x8xf32> to vector<8x8xf32>
    %89 = vector.shape_cast %86 : vector<8x8xf32> to vector<8x1x8xf32>
    tpu.vector_store %arg3[%c0_51, %c5_52, %c0_53], %89 {strides = array<i32>} : memref<8x8x8xf32, #tpu.memory_space<vmem>>, vector<8x1x8xf32>,
    %c0_54 = arith.constant 0 : index
    %c12 = arith.constant 12 : index
    %c0_55 = arith.constant 0 : index
    %90 = vector.load %arg2[%c0_54, %c12, %c0_55] : memref<8x16x16xf32, #tpu.memory_space<vmem>>, vector<8x1x16xf32>
    %91 = vector.shape_cast %90 : vector<8x1x16xf32> to vector<8x16xf32>
    %c0_56 = arith.constant 0 : index
    %c13 = arith.constant 13 : index
    %c0_57 = arith.constant 0 : index
    %92 = vector.load %arg2[%c0_56, %c13, %c0_57] : memref<8x16x16xf32, #tpu.memory_space<vmem>>, vector<8x1x16xf32>
    %93 = vector.shape_cast %92 : vector<8x1x16xf32> to vector<8x16xf32>
    %94 = arith.maximumf %91, %93 : vector<8x16xf32>
    %cst_58 = arith.constant dense<0.000000e+00> : vector<8x128xf32>
    %95 = tpu.matmul %94, %8, %cst_58 {dimension_numbers = #tpu.dot_dimension_numbers<[1], [0], [0], [1], [0, 0, 1, 1], [], []>, precision = #tpu.contract_precision<fp32>} : vector<8x16xf32>, vector<16x128xf32>, vector<8x128xf32> -> vector<8x128xf32>
    %cst_59 = arith.constant dense<0.000000e+00> : vector<8x128xf32>
    %96 = tpu.matmul %94, %17, %cst_59 {dimension_numbers = #tpu.dot_dimension_numbers<[1], [0], [0], [1], [0, 0, 1, 1], [], []>, precision = #tpu.contract_precision<fp32>} : vector<8x16xf32>, vector<16x128xf32>, vector<8x128xf32> -> vector<8x128xf32>
    %97 = arith.maximumf %95, %96 : vector<8x128xf32>
    %98 = vector.extract_strided_slice %97 {offsets = [0, 0], sizes = [8, 8], strides = [1, 1]} : vector<8x128xf32> to vector<8x8xf32>
    %c0_60 = arith.constant 0 : index
    %c6_61 = arith.constant 6 : index
    %c0_62 = arith.constant 0 : index
    %99 = vector.load %arg3[%c0_60, %c6_61, %c0_62] : memref<8x8x8xf32, #tpu.memory_space<vmem>>, vector<8x1x8xf32>
    %100 = vector.shape_cast %99 : vector<8x1x8xf32> to vector<8x8xf32>
    %101 = vector.shape_cast %98 : vector<8x8xf32> to vector<8x1x8xf32>
    tpu.vector_store %arg3[%c0_60, %c6_61, %c0_62], %101 {strides = array<i32>} : memref<8x8x8xf32, #tpu.memory_space<vmem>>, vector<8x1x8xf32>,
    %c0_63 = arith.constant 0 : index
    %c14 = arith.constant 14 : index
    %c0_64 = arith.constant 0 : index
    %102 = vector.load %arg2[%c0_63, %c14, %c0_64] : memref<8x16x16xf32, #tpu.memory_space<vmem>>, vector<8x1x16xf32>
    %103 = vector.shape_cast %102 : vector<8x1x16xf32> to vector<8x16xf32>
    %c0_65 = arith.constant 0 : index
    %c15 = arith.constant 15 : index
    %c0_66 = arith.constant 0 : index
    %104 = vector.load %arg2[%c0_65, %c15, %c0_66] : memref<8x16x16xf32, #tpu.memory_space<vmem>>, vector<8x1x16xf32>
    %105 = vector.shape_cast %104 : vector<8x1x16xf32> to vector<8x16xf32>
    %106 = arith.maximumf %103, %105 : vector<8x16xf32>
    %cst_67 = arith.constant dense<0.000000e+00> : vector<8x128xf32>
    %107 = tpu.matmul %106, %8, %cst_67 {dimension_numbers = #tpu.dot_dimension_numbers<[1], [0], [0], [1], [0, 0, 1, 1], [], []>, precision = #tpu.contract_precision<fp32>} : vector<8x16xf32>, vector<16x128xf32>, vector<8x128xf32> -> vector<8x128xf32>
    %cst_68 = arith.constant dense<0.000000e+00> : vector<8x128xf32>
    %108 = tpu.matmul %106, %17, %cst_68 {dimension_numbers = #tpu.dot_dimension_numbers<[1], [0], [0], [1], [0, 0, 1, 1], [], []>, precision = #tpu.contract_precision<fp32>} : vector<8x16xf32>, vector<16x128xf32>, vector<8x128xf32> -> vector<8x128xf32>
    %109 = arith.maximumf %107, %108 : vector<8x128xf32>
    %110 = vector.extract_strided_slice %109 {offsets = [0, 0], sizes = [8, 8], strides = [1, 1]} : vector<8x128xf32> to vector<8x8xf32>
    %c0_69 = arith.constant 0 : index
    %c7_70 = arith.constant 7 : index
    %c0_71 = arith.constant 0 : index
    %111 = vector.load %arg3[%c0_69, %c7_70, %c0_71] : memref<8x8x8xf32, #tpu.memory_space<vmem>>, vector<8x1x8xf32>
    %112 = vector.shape_cast %111 : vector<8x1x8xf32> to vector<8x8xf32>
    %113 = vector.shape_cast %110 : vector<8x8xf32> to vector<8x1x8xf32>
    tpu.vector_store %arg3[%c0_69, %c7_70, %c0_71], %113 {strides = array<i32>} : memref<8x8x8xf32, #tpu.memory_space<vmem>>, vector<8x1x8xf32>,
    return
  }
  func.func @transform_0(%arg0: i32, %arg1: i32) -> (i32, i32, i32) {
    %c0_i32 = arith.constant 0 : i32
    %c0_i32_0 = arith.constant 0 : i32
    return %arg0, %arg1, %c0_i32 : i32, i32, i32
  }
  func.func @transform_1(%arg0: i32, %arg1: i32) -> (i32, i32, i32) {
    %c0_i32 = arith.constant 0 : i32
    %c0_i32_0 = arith.constant 0 : i32
    return %arg0, %arg1, %c0_i32 : i32, i32, i32
  }
}

</mosaic_0001>

<bundles_post_ra>
// kernel: downsample.1
= control target key start
LH: loop header
LB: loop body
LE: loop exit
PB: predicated region body
PF: predicated region fallthrough
CT: control target
= control target key end

     0   :  { %6 = vsyncpa [#allocation3], 0  ;;  %s10819_s0 = inlined_call_operand.hbm [shape: f32[8,16,16], index: 0, kind: input, shape index: {}]   ;;  %s10820_s1 = inlined_call_operand.hbm [shape: f32[8,8,8], index: 1, kind: output, shape index: {}]  }
   0x1   :  { %7 = vsyncpa [#allocation4], 0  ;;  %s9897_s6 = smov [#allocation2]   ;;  %s9849_s10 = scalar_lea.hbm %s10819_s0, 2048 }
   0x2   :  { %s13_s7 = sshll.u32 %s9897_s6, 4  ;;  %p9850_p0 = scmp.ne.s32.totalorder %s10819_s0, %s9849_s10  ;;  %s14_s7 = int_to_ptr.vmem [resolvable:$true] %s13_s7 }
   0x3   :  { %p9853_p1 = scmp.lt.u32.totalorder %s9849_s10, %s10819_s0 }
   0x5   :  { %p9855_p2 = pnand %p9853_p1, %p9850_p0 }
   0x7   :  { %9858 = shalt.err (!%p9855_p2)
}
   0x8   :  { %s9859_s15 = scalar_lea.vmem %s14_s7, 2048  ;;  %p9864_p4 = scmp.lt.s32.totalorder %s14_s7, %s14_s7 }
   0x9   :  { %p9860_p3 = scmp.ne.s32.totalorder %s14_s7, %s9859_s15  ;;  %p9865_p5 = scmp.lt.s32.totalorder %s9859_s15, %s9859_s15 }
   0xb   :  { %p9866_p6 = por %p9865_p5, %p9864_p4 }
   0xd   :  { %p9867_p7 = pnand %p9866_p6, %p9860_p3 }
   0xf   :  { %9870 = shalt.err (!%p9867_p7)
}
  0x10   :  { %s9898_s16 = smov 128   ;;  %s9899_s17 = smov 8  }
  0x11   :  { %19 = dma.hbm_to_vmem [thread:$0]  %s10819_s0, 2048, %s14_s7, [#allocation3], %s9898_s16, %s9898_s16, %s9899_s17  }
  0x12   :  { %9893 = dma.done.wait [#allocation3], 2048  }
  0x13   :  { %9894 = vsyncadd [#allocation3], 4294965248  ;;  %v23_v0 = vlaneseq  ;;  %v9900_v1 = vmov 0.0|0.0   ;;  %vm9901_vm0 = vmmov 0   ;;  %v9902_v4 = vmov 0.0   ;;  %s9905_s0 = smov [#allocation5]  }
  0x14   :  { %9392 = vmatprep.subr.bf16.mxu0 %v9900_v1  ;;  %9410 = vmatprep.subr.bf16.mxu1 %v9900_v1  ;;  %vm75_vm1 = vcmask 1041409   ;;  %vm78_vm2 = vcmask 1042434   ;;  %vm81_vm5 = vcmask 1043459   ;;  %v42_v9 = vld [vmem:[#allocation2] sm:$0x1]  ;;  %vm84_vm10 = vcmask 1044484  }
  0x15   :  { %v9933_v2 = vshrl.u32 %v23_v0, 7  ;;  %v27_v3 = vand.u32 127, %v23_v0  ;;  %8724 = vmatprep.mubr.msk.f32.mxu0 %vm9901_vm0, %v9902_v4  ;;  %8766 = vmatprep.mubr.msk.f32.mxu1 %vm9901_vm0, %v9902_v4  ;;  %v43_v10 = vld [vmem:[#allocation2 + $0x10] sm:$0x1]  ;;  %v9903_v13 = vmov 1.0|1.0  }
  0x16   :  { %v44_v14 = vld [vmem:[#allocation2 + $0x20] sm:$0x1]  ;;  %v45_v15 = vld [vmem:[#allocation2 + $0x30] sm:$0x1]  ;;  %v50_v23 = vld [vmem:[#allocation2 + $0x1] sm:$0x1] }
  0x17   :  { %v25_v5 = vadd.s32 8, %v9933_v2  ;;  %v28_v6 = vmul.u32 2, %v27_v3  ;;  %v46_v16 = vld [vmem:[#allocation2 + $0x40] sm:$0x1]  ;;  %v47_v18 = vld [vmem:[#allocation2 + $0x50] sm:$0x1]  ;;  %v58_v28 = vmax.f32 %v42_v9, %v50_v23 }
  0x18   :  { %v48_v19 = vld [vmem:[#allocation2 + $0x60] sm:$0x1]  ;;  %v49_v22 = vld [vmem:[#allocation2 + $0x70] sm:$0x1]  ;;  %v51_v24 = vld [vmem:[#allocation2 + $0x11] sm:$0x1] }
  0x19   :  { %vm29_vm3 = vcmp.eq.s32.totalorder %v9933_v2, %v28_v6  ;;  %vm30_vm4 = vcmp.eq.s32.totalorder %v25_v5, %v28_v6  ;;  %v35_v7 = vadd.s32 1, %v28_v6  ;;  %v52_v25 = vld [vmem:[#allocation2 + $0x21] sm:$0x1]  ;;  %v53_v26 = vld [vmem:[#allocation2 + $0x31] sm:$0x1]  ;;  %v59_v29 = vmax.f32 %v43_v10, %v51_v24  ;;  %s8320_s20 = sshll.u32 %s9905_s0, 4  ;;  %s8321_s20 = int_to_ptr.vmem [resolvable:$true] %s8320_s20 }
  0x1a   :  { %vm9941_vm6 = vmpackc.low %vm30_vm4, %vm29_vm3  ;;  %v8332_v11 = vsel %vm29_vm3, 1.0, %v9902_v4  ;;  %v8333_v12 = vsel %vm30_vm4, 1.0, %v9902_v4  ;;  %v54_v27 = vld [vmem:[#allocation2 + $0x41] sm:$0x1]  ;;  %v55_v32 = vld [vmem:[#allocation2 + $0x51] sm:$0x1]  ;;  %v60_v35 = vmax.f32 %v44_v14, %v52_v25  ;;  %v61_v36 = vmax.f32 %v45_v15, %v53_v26  ;;  %p9876_p9 = scmp.lt.s32.totalorder %s8321_s20, %s8321_s20 }
  0x1b   :  { %9394 = vmatpush3.bf16.msk.msra.mxu0 %vm9941_vm6, %v9903_v13  ;;  %vm36_vm7 = vcmp.eq.s32.totalorder %v9933_v2, %v35_v7  ;;  %vm37_vm8 = vcmp.eq.s32.totalorder %v25_v5, %v35_v7  ;;  %v9962_v30 = vsub.f32 %v8332_v11, %v8332_v11  ;;  %v9964_v31 = vsub.f32 %v8333_v12, %v8333_v12  ;;  %v56_v33 = vld [vmem:[#allocation2 + $0x61] sm:$0x1]  ;;  %v57_v34 = vld [vmem:[#allocation2 + $0x71] sm:$0x1]  ;;  %v1085_v5 = vld [vmem:[#allocation2 + $0x12] sm:$0x1] }
  0x1c   :  { %vm9951_vm9 = vmpackc.low %vm37_vm8, %vm36_vm7  ;;  %9395 = vmatprep.subr.bf16.mxu0 %v9900_v1  ;;  %v8334_v20 = vsel %vm36_vm7, 1.0, %v9902_v4  ;;  %v8335_v21 = vsel %vm37_vm8, 1.0, %v9902_v4  ;;  %v62_v37 = vmax.f32 %v46_v16, %v54_v27  ;;  %v63_v39 = vmax.f32 %v47_v18, %v55_v32  ;;  %v1093_v6 = vld [vmem:[#allocation2 + $0x13] sm:$0x1]  ;;  %v1084_v10 = vld [vmem:[#allocation2 + $0x2] sm:$0x1] }
  0x1d   :  { %9412 = vmatpush3.bf16.msk.msra.mxu1 %vm9951_vm9, %v9903_v13  ;;  %v9966_v38 = vsub.f32 %v8334_v20, %v8334_v20  ;;  %v64_v40 = vmax.f32 %v48_v19, %v56_v33  ;;  %v65_v41 = vmax.f32 %v49_v22, %v57_v34  ;;  %v74_v42 = vrot.slane %v59_v29, 7  ;;  %v1086_v11 = vld [vmem:[#allocation2 + $0x22] sm:$0x1]  ;;  %v1094_v12 = vld [vmem:[#allocation2 + $0x23] sm:$0x1]  ;;  %s9871_s21 = scalar_lea.vmem %s8321_s20, 1024 }
  0x1e   :  { %9413 = vmatprep.subr.bf16.mxu1 %v9900_v1  ;;  %v77_v43 = vrot.slane %v60_v35, 6  ;;  %v80_v44 = vrot.slane %v61_v36, 5  ;;  %v83_v45 = vrot.slane %v62_v37, 4  ;;  %v9968_v46 = vsub.f32 %v8335_v21, %v8335_v21  ;;  %v1092_v20 = vld [vmem:[#allocation2 + $0x3] sm:$0x1]  ;;  %p9872_p8 = scmp.ne.s32.totalorder %s8321_s20, %s9871_s21  ;;  %p9877_p10 = scmp.lt.s32.totalorder %s9871_s21, %s9871_s21 }
  0x1f   :  { %v76_v47 = vsel %vm75_vm1, %v74_v42, %v58_v28  ;;  %v86_v48 = vrot.slane %v63_v39, 3  ;;  %vm87_vm11 = vcmask 1045509   ;;  %v89_v50 = vrot.slane %v64_v40, 2  ;;  %v1087_v22 = vld [vmem:[#allocation2 + $0x32] sm:$0x1] }
  0x20   :  { %v79_v49 = vsel %vm78_vm2, %v77_v43, %v76_v47  ;;  %vm90_vm12 = vcmask 1046534   ;;  %v92_v52 = vrot.slane %v65_v41, 1  ;;  %vm93_vm13 = vcmask 1047559   ;;  %v1095_v23 = vld [vmem:[#allocation2 + $0x33] sm:$0x1]  ;;  %p9878_p11 = por %p9877_p10, %p9876_p9 }
  0x21   :  { %v82_v51 = vsel %vm81_vm5, %v80_v44, %v79_v49  ;;  %v178_v53 = vand.u32 4294901760, %v9962_v30  ;;  %v185_v55 = vand.u32 4294901760, %v9964_v31  ;;  %v637_v56 = vand.u32 4294901760, %v9966_v38  ;;  %v1088_v33 = vld [vmem:[#allocation2 + $0x42] sm:$0x1] }
  0x22   :  { %v85_v54 = vsel %vm84_vm10, %v83_v45, %v82_v51  ;;  %v644_v57 = vand.u32 4294901760, %v9968_v46  ;;  %vm95_vm14 = vcmask 130048   ;;  %v1101_v14 = vmax.f32 %v1085_v5, %v1093_v6  ;;  %v1096_v34 = vld [vmem:[#allocation2 + $0x43] sm:$0x1]  ;;  %v1089_v39 = vld [vmem:[#allocation2 + $0x52] sm:$0x1]  ;;  %p9879_p12 = pnand %p9878_p11, %p9872_p8 }
  0x23   :  { %v88_v58 = vsel %vm87_vm11, %v86_v48, %v85_v54  ;;  %v179_v61 = vsub.f32 %v9962_v30, %v178_v53  ;;  %v186_v63 = vsub.f32 %v9964_v31, %v185_v55  ;;  %v638_v0 = vsub.f32 %v9966_v38, %v637_v56  ;;  %v1097_v40 = vld [vmem:[#allocation2 + $0x53] sm:$0x1]  ;;  %v1090_v44 = vld [vmem:[#allocation2 + $0x62] sm:$0x1]  ;;  %v1098_v45 = vld [vmem:[#allocation2 + $0x63] sm:$0x1] }
  0x24   :  { %v91_v59 = vsel %vm90_vm12, %v89_v50, %v88_v58  ;;  %v645_v3 = vsub.f32 %v9968_v46, %v644_v57  ;;  %v1102_v24 = vmax.f32 %v1086_v11, %v1094_v12  ;;  %v1100_v26 = vmax.f32 %v1084_v10, %v1092_v20  ;;  %v1099_v54 = vld [vmem:[#allocation2 + $0x73] sm:$0x1]  ;;  %v2117_v12 = vld [vmem:[#allocation2 + $0x4] sm:$0x1] }
  0x25   :  { %v94_v60 = vsel %vm93_vm13, %v92_v52, %v91_v59  ;;  %v180_v15 = vand.u32 4294901760, %v179_v61  ;;  %v187_v16 = vand.u32 4294901760, %v186_v63  ;;  %v639_v18 = vand.u32 4294901760, %v638_v0  ;;  %v1091_v52 = vld [vmem:[#allocation2 + $0x72] sm:$0x1] }
  0x26   :  { %v96_v62 = vsel %vm95_vm14, %v94_v60, 0  ;;  %v646_v19 = vand.u32 4294901760, %v645_v3  ;;  %v1116_v27 = vrot.slane %v1101_v14, 7  ;;  %v1103_v35 = vmax.f32 %v1087_v22, %v1095_v23  ;;  %v2125_v14 = vld [vmem:[#allocation2 + $0x5] sm:$0x1] }
  0x27   :  { %v9994_v7 = vand.u32 4294901760, %v96_v62  ;;  %v10004_v28 = vpack.c.bf16 %v187_v16, %v180_v15  ;;  %v1118_v36 = vrot.slane %v1102_v24, 6  ;;  %v1104_v41 = vmax.f32 %v1088_v33, %v1096_v34  ;;  %v2120_v15 = vld [vmem:[#allocation2 + $0x34] sm:$0x1]  ;;  %v2128_v16 = vld [vmem:[#allocation2 + $0x35] sm:$0x1] }
  0x28   :  { %v10006_v29 = vpack.c.bf16 %v646_v19, %v639_v18  ;;  %v1117_v37 = vsel %vm75_vm1, %v1116_v27, %v1100_v26  ;;  %v1120_v42 = vrot.slane %v1103_v35, 5  ;;  %v1105_v47 = vmax.f32 %v1089_v39, %v1097_v40  ;;  %v2121_v22 = vld [vmem:[#allocation2 + $0x44] sm:$0x1]  ;;  %v2129_v23 = vld [vmem:[#allocation2 + $0x45] sm:$0x1] }
  0x29   :  { %v9997_v9 = vsub.f32 %v96_v62, %v9994_v7  ;;  %v1119_v43 = vsel %vm78_vm2, %v1118_v36, %v1117_v37  ;;  %v10020_v48 = vpack.c.bf16 %v9964_v31, %v9962_v30  ;;  %v10024_v49 = vpack.c.bf16 %v9968_v46, %v9966_v38  ;;  %v2118_v38 = vld [vmem:[#allocation2 + $0x14] sm:$0x1]  ;;  %v2126_v46 = vld [vmem:[#allocation2 + $0x15] sm:$0x1]  ;;  %v2123_v35 = vld [vmem:[#allocation2 + $0x64] sm:$0x1] }
  0x2a   :  { %v1122_v50 = vrot.slane %v1104_v41, 4  ;;  %v1121_v51 = vsel %vm81_vm5, %v1120_v42, %v1119_v43  ;;  %v1106_v58 = vmax.f32 %v1090_v44, %v1098_v45  ;;  %v1124_v59 = vrot.slane %v1105_v47, 3  ;;  %v2122_v26 = vld [vmem:[#allocation2 + $0x54] sm:$0x1]  ;;  %v2130_v27 = vld [vmem:[#allocation2 + $0x55] sm:$0x1] }
  0x2b   :  { %v10000_v21 = vand.u32 4294901760, %v9997_v9  ;;  %v1107_v61 = vmax.f32 %v1091_v52, %v1099_v54  ;;  %v10059_v6 = vpack.c.bf16 %v185_v55, %v178_v53  ;;  %v2119_v55 = vld [vmem:[#allocation2 + $0x24] sm:$0x1]  ;;  %v2133_v20 = vmax.f32 %v2117_v12, %v2125_v14  ;;  %v2131_v36 = vld [vmem:[#allocation2 + $0x65] sm:$0x1] }
  0x2c   :  { %v1123_v60 = vsel %vm84_vm10, %v1122_v50, %v1121_v51  ;;  %v1126_v62 = vrot.slane %v1106_v58, 2  ;;  %v2136_v24 = vmax.f32 %v2120_v15, %v2128_v16  ;;  %v2138_v37 = vmax.f32 %v2122_v26, %v2130_v27  ;;  %v2124_v41 = vld [vmem:[#allocation2 + $0x74] sm:$0x1]  ;;  %v2132_v42 = vld [vmem:[#allocation2 + $0x75] sm:$0x1] }
  0x2d   :  { %v168_v25 = vsub.f32 %v9997_v9, %v10000_v21  ;;  %v1125_v63 = vsel %vm87_vm11, %v1124_v59, %v1123_v60  ;;  %v1128_v0 = vrot.slane %v1107_v61, 1  ;;  %v2139_v43 = vmax.f32 %v2123_v35, %v2131_v36  ;;  %v3154_v14 = vld [vmem:[#allocation2 + $0x46] sm:$0x1]  ;;  %v3162_v15 = vld [vmem:[#allocation2 + $0x47] sm:$0x1] }
  0x2e   :  { %v1127_v3 = vsel %vm90_vm12, %v1126_v62, %v1125_v63  ;;  %v2153_v33 = vrot.slane %v2136_v24, 5  ;;  %v2157_v44 = vrot.slane %v2138_v37, 3  ;;  %v2140_v47 = vmax.f32 %v2124_v41, %v2132_v42  ;;  %v3151_v63 = vld [vmem:[#allocation2 + $0x16] sm:$0x1]  ;;  %v3156_v24 = vld [vmem:[#allocation2 + $0x66] sm:$0x1] }
  0x2f   :  { %v169_v32 = vand.u32 4294901760, %v168_v25  ;;  %v1129_v5 = vsel %vm93_vm13, %v1128_v0, %v1127_v3  ;;  %v2159_v50 = vrot.slane %v2139_v43, 2  ;;  %v3159_v0 = vld [vmem:[#allocation2 + $0x17] sm:$0x1]  ;;  %vm1075_vm15 = vcmask 57344  }
  0x30   :  { %v1130_v10 = vsel %vm95_vm14, %v1129_v5, 0  ;;  %v2161_v52 = vrot.slane %v2140_v47, 1  ;;  %v3152_v5 = vld [vmem:[#allocation2 + $0x26] sm:$0x1] }
  0x31   :  { %8725 = vmatmul.mubr.f32.vlgmr.msra.gmra.mrb[0].mxu0 %v169_v32  ;;  %8767 = vmatmul.mubr.f32.vlgmr.msra.gmra.mrb[0].mxu1 %v169_v32  ;;  %v10070_v11 = vand.u32 4294901760, %v1130_v10  ;;  %v2137_v32 = vmax.f32 %v2121_v22, %v2129_v23 }
  0x32   :  { %9397 = vmatpush3.bf16.msra.mxu0 %v10004_v28  ;;  %9415 = vmatpush3.bf16.msra.mxu1 %v10006_v29 }
  0x33   :  { %8731 = vmatprep.mubr.msk.f32.mxu0 %vm9901_vm0, %v9902_v4  ;;  %9398 = vmatprep.subr.bf16.mxu0 %v9900_v1  ;;  %v10081_v30 = vsub.f32 %v1130_v10, %v10070_v11  ;;  %v2155_v39 = vrot.slane %v2137_v32, 4  ;;  %v3160_v10 = vld [vmem:[#allocation2 + $0x27] sm:$0x1]  ;;  %v3157_v32 = vld [vmem:[#allocation2 + $0x76] sm:$0x1] }
  0x34   :  { %8773 = vmatprep.mubr.msk.f32.mxu1 %vm9901_vm0, %v9902_v4  ;;  %9416 = vmatprep.subr.bf16.mxu1 %v9900_v1 }
  0x35   :  { %v10086_v31 = vand.u32 4294901760, %v10081_v30 }
  0x37   :  { %v1202_v53 = vsub.f32 %v10081_v30, %v10086_v31 }
  0x39   :  { %8732 = vmatmul.mubr.f32.vlgmr.msra.gmra.mrb[0].mxu0 %v9994_v7  ;;  %8774 = vmatmul.mubr.f32.vlgmr.msra.gmra.mrb[0].mxu1 %v9994_v7  ;;  %v1203_v19 = vand.u32 4294901760, %v1202_v53  ;;  %v3161_v53 = vld [vmem:[#allocation2 + $0x37] sm:$0x1] }
  0x3a   :  { %9400 = vmatpush3.bf16.msra.mxu0 %v10020_v48  ;;  %9418 = vmatpush3.bf16.msra.mxu1 %v10024_v49 }
  0x3b   :  { %8738 = vmatprep.mubr.msk.f32.mxu0 %vm9901_vm0, %v9902_v4  ;;  %9401 = vmatprep.subr.bf16.mxu0 %v9900_v1 }
  0x3c   :  { %8780 = vmatprep.mubr.msk.f32.mxu1 %vm9901_vm0, %v9902_v4  ;;  %9419 = vmatprep.subr.bf16.mxu1 %v9900_v1 }
  0x41   :  { %8739 = vmatmul.mubr.f32.vlgmr.msra.gmra.mrb[0].mxu0 %v9997_v9  ;;  %8781 = vmatmul.mubr.f32.vlgmr.msra.gmra.mrb[0].mxu1 %v9997_v9  ;;  %v10065_v9 = vpack.c.bf16 %v644_v57, %v637_v56  ;;  %v2127_v56 = vld [vmem:[#allocation2 + $0x25] sm:$0x1]  ;;  %v2134_v57 = vmax.f32 %v2118_v38, %v2126_v46  ;;  %v3158_v38 = vld [vmem:[#allocation2 + $0x7] sm:$0x1]  ;;  %v3153_v46 = vld [vmem:[#allocation2 + $0x36] sm:$0x1] }
  0x42   :  { %9403 = vmatpush3.bf16.msk.msra.mxu0 %vm9941_vm6, %v9903_v13  ;;  %9421 = vmatpush3.bf16.msk.msra.mxu1 %vm9951_vm9, %v9903_v13  ;;  %v2135_v18 = vmax.f32 %v2119_v55, %v2127_v56  ;;  %v3168_v55 = vmax.f32 %v3152_v5, %v3160_v10  ;;  %v3169_v16 = vmax.f32 %v3153_v46, %v3161_v53  ;;  %v4195_v46 = vld [vmem:[#allocation2 + $0x49] sm:$0x1] }
  0x43   :  { %8745 = vmatprep.mubr.msk.f32.mxu0 %vm9901_vm0, %v9902_v4  ;;  %9404 = vmatprep.subr.bf16.mxu0 %v9900_v1 }
  0x44   :  { %8787 = vmatprep.mubr.msk.f32.mxu1 %vm9901_vm0, %v9902_v4  ;;  %9422 = vmatprep.subr.bf16.mxu1 %v9900_v1  ;;  %v3186_v22 = vrot.slane %v3169_v16, 5  ;;  %v4189_v16 = vld [vmem:[#allocation2 + $0x68] sm:$0x1] }
  0x49   :  { %8746 = vmatmul.mubr.f32.vlgmr.msra.gmra.mrb[0].mxu0 %v10000_v21  ;;  %8788 = vmatmul.mubr.f32.vlgmr.msra.gmra.mrb[0].mxu1 %v10000_v21  ;;  %v2149_v21 = vrot.slane %v2134_v57, 7 }
  0x4a   :  { %9406 = vmatpush3.bf16.msra.mxu0 %v10059_v6  ;;  %9424 = vmatpush3.bf16.msra.mxu1 %v10065_v9 }
  0x4b   :  { %8752 = vmatprep.mubr.msk.f32.mxu0 %vm9901_vm0, %v9902_v4  ;;  %9407 = vmatprep.subr.bf16.mxu0 %v9900_v1  ;;  %v2150_v25 = vsel %vm75_vm1, %v2149_v21, %v2133_v20  ;;  %v3163_v20 = vld [vmem:[#allocation2 + $0x57] sm:$0x1]  ;;  %v3170_v21 = vmax.f32 %v3154_v14, %v3162_v15 }
  0x4c   :  { %8794 = vmatprep.mubr.msk.f32.mxu1 %vm9901_vm0, %v9902_v4  ;;  %9425 = vmatprep.subr.bf16.mxu1 %v9900_v1 }
  0x4d   :  { %v3188_v26 = vrot.slane %v3170_v21, 4  ;;  %v4190_v21 = vld [vmem:[#allocation2 + $0x78] sm:$0x1] }
  0x51   :  { %8753 = vmatmul.mubr.f32.vlgmr.msra.gmra.mrb[0].mxu0 %v9994_v7  ;;  %8795 = vmatmul.mubr.f32.vlgmr.msra.gmra.mrb[0].mxu1 %v9994_v7 }
  0x52   :  { %9409 = vmatpush3.bf16.msk.msra.mxu0 %vm9941_vm6, %v9903_v13  ;;  %9427 = vmatpush3.bf16.msk.msra.mxu1 %vm9951_vm9, %v9903_v13 }
  0x53   :  { %8759 = vmatprep.mubr.msk.f32.mxu0 %vm9901_vm0, %v9902_v4  ;;  %8801 = vmatprep.mubr.msk.f32.mxu1 %vm9901_vm0, %v9902_v4 }
  0x54   :  { %9428 = vmatprep.subr.bf16.mxu0 %v9900_v1  ;;  %9446 = vmatprep.subr.bf16.mxu1 %v9900_v1 }
  0x59   :  { %8760 = vmatmul.mubr.f32.vlgmr.msra.gmra.mrb[0].mxu0 %v9994_v7  ;;  %8802 = vmatmul.mubr.f32.vlgmr.msra.gmra.mrb[0].mxu1 %v9994_v7  ;;  %v2151_v7 = vrot.slane %v2135_v18, 6 }
  0x5a   :  { %9430 = vmatpush3.bf16.msk.msra.mxu0 %vm9941_vm6, %v9903_v13  ;;  %9448 = vmatpush3.bf16.msk.msra.mxu1 %vm9951_vm9, %v9903_v13 }
  0x5b   :  { %8808 = vmatprep.mubr.msk.f32.mxu0 %vm9901_vm0, %v9902_v4  ;;  %9431 = vmatprep.subr.bf16.mxu0 %v9900_v1  ;;  %v2152_v34 = vsel %vm78_vm2, %v2151_v7, %v2150_v25  ;;  %v3164_v7 = vld [vmem:[#allocation2 + $0x67] sm:$0x1] }
  0x5c   :  { %8850 = vmatprep.mubr.msk.f32.mxu1 %vm9901_vm0, %v9902_v4  ;;  %9449 = vmatprep.subr.bf16.mxu1 %v9900_v1  ;;  %v2154_v40 = vsel %vm81_vm5, %v2153_v33, %v2152_v34  ;;  %v3165_v33 = vld [vmem:[#allocation2 + $0x77] sm:$0x1]  ;;  %v3172_v34 = vmax.f32 %v3156_v24, %v3164_v7 }
  0x5d   :  { %8809 = vmatmul.mubr.f32.vlgmr.msra.gmra.mrb[2].mxu0 %v1203_v19  ;;  %8851 = vmatmul.mubr.f32.vlgmr.msra.gmra.mrb[2].mxu1 %v1203_v19  ;;  %v2156_v45 = vsel %vm84_vm10, %v2155_v39, %v2154_v40  ;;  %v3155_v19 = vld [vmem:[#allocation2 + $0x56] sm:$0x1]  ;;  %v3173_v37 = vmax.f32 %v3157_v32, %v3165_v33 }
  0x5e   :  { %9433 = vmatpush3.bf16.msra.mxu0 %v10004_v28  ;;  %9451 = vmatpush3.bf16.msra.mxu1 %v10006_v29  ;;  %v2158_v51 = vsel %vm87_vm11, %v2157_v44, %v2156_v45  ;;  %v3171_v25 = vmax.f32 %v3155_v19, %v3163_v20  ;;  %v3192_v39 = vrot.slane %v3172_v34, 2 }
  0x5f   :  { %8815 = vmatprep.mubr.msk.f32.mxu0 %vm9901_vm0, %v9902_v4  ;;  %9434 = vmatprep.subr.bf16.mxu0 %v9900_v1  ;;  %v2160_v54 = vsel %vm90_vm12, %v2159_v50, %v2158_v51  ;;  %v3194_v41 = vrot.slane %v3173_v37, 1  ;;  %v4184_v51 = vld [vmem:[#allocation2 + $0x18] sm:$0x1] }
  0x60   :  { %8857 = vmatprep.mubr.msk.f32.mxu1 %vm9901_vm0, %v9902_v4  ;;  %9452 = vmatprep.subr.bf16.mxu1 %v9900_v1  ;;  %v2162_v58 = vsel %vm93_vm13, %v2161_v52, %v2160_v54  ;;  %v3190_v35 = vrot.slane %v3171_v25, 3  ;;  %v4192_v52 = vld [vmem:[#allocation2 + $0x19] sm:$0x1] }
  0x61   :  { %v2163_v59 = vsel %vm95_vm14, %v2162_v58, 0  ;;  %v4185_v58 = vld [vmem:[#allocation2 + $0x28] sm:$0x1] }
  0x62   :  { %v10158_v60 = vand.u32 4294901760, %v2163_v59 }
  0x64   :  { %v10169_v61 = vsub.f32 %v2163_v59, %v10158_v60  ;;  %v4193_v59 = vld [vmem:[#allocation2 + $0x29] sm:$0x1] }
  0x65   :  { %8816 = vmatmul.mubr.f32.vlgmr.msra.gmra.mrb[2].mxu0 %v10070_v11  ;;  %8858 = vmatmul.mubr.f32.vlgmr.msra.gmra.mrb[2].mxu1 %v10070_v11  ;;  %v4201_v5 = vmax.f32 %v4185_v58, %v4193_v59 }
  0x66   :  { %9436 = vmatpush3.bf16.msra.mxu0 %v10020_v48  ;;  %9454 = vmatpush3.bf16.msra.mxu1 %v10024_v49  ;;  %v10174_v62 = vand.u32 4294901760, %v10169_v61 }
  0x67   :  { %8822 = vmatprep.mubr.msk.f32.mxu0 %vm9901_vm0, %v9902_v4  ;;  %9437 = vmatprep.subr.bf16.mxu0 %v9900_v1 }
  0x68   :  { %8864 = vmatprep.mubr.msk.f32.mxu1 %vm9901_vm0, %v9902_v4  ;;  %9455 = vmatprep.subr.bf16.mxu1 %v9900_v1  ;;  %v2235_v3 = vsub.f32 %v10169_v61, %v10174_v62 }
  0x6a   :  { %v2236_v56 = vand.u32 4294901760, %v2235_v3  ;;  %v4194_v3 = vld [vmem:[#allocation2 + $0x39] sm:$0x1] }
  0x6d   :  { %8823 = vmatmul.mubr.f32.vlgmr.msra.gmra.mrb[2].mxu0 %v10081_v30  ;;  %8865 = vmatmul.mubr.f32.vlgmr.msra.gmra.mrb[2].mxu1 %v10081_v30  ;;  %v3167_v30 = vmax.f32 %v3151_v63, %v3159_v0  ;;  %v4191_v63 = vld [vmem:[#allocation2 + $0x9] sm:$0x1]  ;;  %v4186_v0 = vld [vmem:[#allocation2 + $0x38] sm:$0x1] }
  0x6e   :  { %9439 = vmatpush3.bf16.msk.msra.mxu0 %vm9941_vm6, %v9903_v13  ;;  %9457 = vmatpush3.bf16.msk.msra.mxu1 %vm9951_vm9, %v9903_v13  ;;  %v4202_v53 = vmax.f32 %v4186_v0, %v4194_v3  ;;  %v5228_v0 = vld [vmem:[#allocation2 + $0x4b] sm:$0x1] }
  0x6f   :  { %8829 = vmatprep.mubr.msk.f32.mxu0 %vm9901_vm0, %v9902_v4  ;;  %9440 = vmatprep.subr.bf16.mxu0 %v9900_v1  ;;  %v3182_v12 = vrot.slane %v3167_v30, 7 }
  0x70   :  { %8871 = vmatprep.mubr.msk.f32.mxu1 %vm9901_vm0, %v9902_v4  ;;  %9458 = vmatprep.subr.bf16.mxu1 %v9900_v1  ;;  %v4219_v14 = vrot.slane %v4202_v53, 5  ;;  %v5222_v53 = vld [vmem:[#allocation2 + $0x6a] sm:$0x1] }
  0x75   :  { %8830 = vmatmul.mubr.f32.vlgmr.msra.gmra.mrb[2].mxu0 %v10086_v31  ;;  %8872 = vmatmul.mubr.f32.vlgmr.msra.gmra.mrb[2].mxu1 %v10086_v31  ;;  %v3150_v31 = vld [vmem:[#allocation2 + $0x6] sm:$0x1] }
  0x76   :  { %9442 = vmatpush3.bf16.msra.mxu0 %v10059_v6  ;;  %9460 = vmatpush3.bf16.msra.mxu1 %v10065_v9  ;;  %v3166_v57 = vmax.f32 %v3150_v31, %v3158_v38  ;;  %v4187_v38 = vld [vmem:[#allocation2 + $0x48] sm:$0x1] }
  0x77   :  { %8836 = vmatprep.mubr.msk.f32.mxu0 %vm9901_vm0, %v9902_v4  ;;  %9443 = vmatprep.subr.bf16.mxu0 %v9900_v1 }
  0x78   :  { %8878 = vmatprep.mubr.msk.f32.mxu1 %vm9901_vm0, %v9902_v4  ;;  %9461 = vmatprep.subr.bf16.mxu1 %v9900_v1  ;;  %v3183_v18 = vsel %vm75_vm1, %v3182_v12, %v3166_v57  ;;  %v4196_v57 = vld [vmem:[#allocation2 + $0x59] sm:$0x1]  ;;  %v4203_v12 = vmax.f32 %v4187_v38, %v4195_v46 }
  0x7a   :  { %v4221_v19 = vrot.slane %v4203_v12, 4  ;;  %v5223_v12 = vld [vmem:[#allocation2 + $0x7a] sm:$0x1] }
  0x7d   :  { %8837 = vmatmul.mubr.f32.vlgmr.msra.gmra.mrb[2].mxu0 %v10070_v11  ;;  %8879 = vmatmul.mubr.f32.vlgmr.msra.gmra.mrb[2].mxu1 %v10070_v11 }
  0x7e   :  { %9445 = vmatpush3.bf16.msk.msra.mxu0 %vm9941_vm6, %v9903_v13  ;;  %9463 = vmatpush3.bf16.msk.msra.mxu1 %vm9951_vm9, %v9903_v13 }
  0x7f   :  { %8843 = vmatprep.mubr.msk.f32.mxu0 %vm9901_vm0, %v9902_v4  ;;  %8885 = vmatprep.mubr.msk.f32.mxu1 %vm9901_vm0, %v9902_v4 }
  0x80   :  { %9464 = vmatprep.subr.bf16.mxu0 %v9900_v1  ;;  %9482 = vmatprep.subr.bf16.mxu1 %v9900_v1 }
  0x85   :  { %8844 = vmatmul.mubr.f32.vlgmr.msra.gmra.mrb[2].mxu0 %v10070_v11  ;;  %8886 = vmatmul.mubr.f32.vlgmr.msra.gmra.mrb[2].mxu1 %v10070_v11  ;;  %v3184_v11 = vrot.slane %v3168_v55, 6 }
  0x86   :  { %9466 = vmatpush3.bf16.msk.msra.mxu0 %vm9941_vm6, %v9903_v13  ;;  %9484 = vmatpush3.bf16.msk.msra.mxu1 %vm9951_vm9, %v9903_v13 }
  0x87   :  { %8892 = vmatprep.mubr.msk.f32.mxu0 %vm9901_vm0, %v9902_v4  ;;  %9467 = vmatprep.subr.bf16.mxu0 %v9900_v1  ;;  %v3185_v23 = vsel %vm78_vm2, %v3184_v11, %v3183_v18  ;;  %v4197_v11 = vld [vmem:[#allocation2 + $0x69] sm:$0x1] }
  0x88   :  { %8934 = vmatprep.mubr.msk.f32.mxu1 %vm9901_vm0, %v9902_v4  ;;  %9485 = vmatprep.subr.bf16.mxu1 %v9900_v1  ;;  %v3187_v27 = vsel %vm81_vm5, %v3186_v22, %v3185_v23  ;;  %v4198_v22 = vld [vmem:[#allocation2 + $0x79] sm:$0x1]  ;;  %v4205_v23 = vmax.f32 %v4189_v16, %v4197_v11 }
  0x89   :  { %8893 = vmatmul.mubr.f32.vlgmr.msra.gmra.mrb[4].mxu0 %v2236_v56  ;;  %8935 = vmatmul.mubr.f32.vlgmr.msra.gmra.mrb[4].mxu1 %v2236_v56  ;;  %v3189_v36 = vsel %vm84_vm10, %v3188_v26, %v3187_v27  ;;  %v4188_v56 = vld [vmem:[#allocation2 + $0x58] sm:$0x1]  ;;  %v4206_v25 = vmax.f32 %v4190_v21, %v4198_v22 }
  0x8a   :  { %9469 = vmatpush3.bf16.msra.mxu0 %v10004_v28  ;;  %9487 = vmatpush3.bf16.msra.mxu1 %v10006_v29  ;;  %v3191_v40 = vsel %vm87_vm11, %v3190_v35, %v3189_v36  ;;  %v4204_v18 = vmax.f32 %v4188_v56, %v4196_v57  ;;  %v4225_v26 = vrot.slane %v4205_v23, 2 }
  0x8b   :  { %8899 = vmatprep.mubr.msk.f32.mxu0 %vm9901_vm0, %v9902_v4  ;;  %9470 = vmatprep.subr.bf16.mxu0 %v9900_v1  ;;  %v3193_v42 = vsel %vm90_vm12, %v3192_v39, %v3191_v40  ;;  %v4227_v32 = vrot.slane %v4206_v25, 1  ;;  %v5217_v40 = vld [vmem:[#allocation2 + $0x1a] sm:$0x1] }
  0x8c   :  { %8941 = vmatprep.mubr.msk.f32.mxu1 %vm9901_vm0, %v9902_v4  ;;  %9488 = vmatprep.subr.bf16.mxu1 %v9900_v1  ;;  %v3195_v43 = vsel %vm93_vm13, %v3194_v41, %v3193_v42  ;;  %v4223_v24 = vrot.slane %v4204_v18, 3  ;;  %v5225_v41 = vld [vmem:[#allocation2 + $0x1b] sm:$0x1] }
  0x8d   :  { %v3196_v44 = vsel %vm95_vm14, %v3195_v43, 0  ;;  %v5218_v43 = vld [vmem:[#allocation2 + $0x2a] sm:$0x1] }
  0x8e   :  { %v10246_v45 = vand.u32 4294901760, %v3196_v44 }
  0x90   :  { %v10257_v47 = vsub.f32 %v3196_v44, %v10246_v45  ;;  %v5226_v44 = vld [vmem:[#allocation2 + $0x2b] sm:$0x1] }
  0x91   :  { %8900 = vmatmul.mubr.f32.vlgmr.msra.gmra.mrb[4].mxu0 %v10158_v60  ;;  %8942 = vmatmul.mubr.f32.vlgmr.msra.gmra.mrb[4].mxu1 %v10158_v60  ;;  %v5234_v58 = vmax.f32 %v5218_v43, %v5226_v44 }
  0x92   :  { %9472 = vmatpush3.bf16.msra.mxu0 %v10020_v48  ;;  %9490 = vmatpush3.bf16.msra.mxu1 %v10024_v49  ;;  %v10262_v50 = vand.u32 4294901760, %v10257_v47 }
  0x93   :  { %8906 = vmatprep.mubr.msk.f32.mxu0 %vm9901_vm0, %v9902_v4  ;;  %9473 = vmatprep.subr.bf16.mxu0 %v9900_v1 }
  0x94   :  { %8948 = vmatprep.mubr.msk.f32.mxu1 %vm9901_vm0, %v9902_v4  ;;  %9491 = vmatprep.subr.bf16.mxu1 %v9900_v1  ;;  %v3268_v54 = vsub.f32 %v10257_v47, %v10262_v50 }
  0x96   :  { %v3269_v10 = vand.u32 4294901760, %v3268_v54  ;;  %v5227_v54 = vld [vmem:[#allocation2 + $0x3b] sm:$0x1] }
  0x99   :  { %8907 = vmatmul.mubr.f32.vlgmr.msra.gmra.mrb[4].mxu0 %v10169_v61  ;;  %8949 = vmatmul.mubr.f32.vlgmr.msra.gmra.mrb[4].mxu1 %v10169_v61  ;;  %v4200_v61 = vmax.f32 %v4184_v51, %v4192_v52  ;;  %v5224_v51 = vld [vmem:[#allocation2 + $0xb] sm:$0x1]  ;;  %v5219_v52 = vld [vmem:[#allocation2 + $0x3a] sm:$0x1] }
  0x9a   :  { %9475 = vmatpush3.bf16.msk.msra.mxu0 %vm9941_vm6, %v9903_v13  ;;  %9493 = vmatpush3.bf16.msk.msra.mxu1 %vm9951_vm9, %v9903_v13  ;;  %v5235_v3 = vmax.f32 %v5219_v52, %v5227_v54  ;;  %v6261_v52 = vld [vmem:[#allocation2 + $0x4d] sm:$0x1] }
  0x9b   :  { %8913 = vmatprep.mubr.msk.f32.mxu0 %vm9901_vm0, %v9902_v4  ;;  %9476 = vmatprep.subr.bf16.mxu0 %v9900_v1  ;;  %v4215_v31 = vrot.slane %v4200_v61, 7 }
  0x9c   :  { %8955 = vmatprep.mubr.msk.f32.mxu1 %vm9901_vm0, %v9902_v4  ;;  %9494 = vmatprep.subr.bf16.mxu1 %v9900_v1  ;;  %v5252_v38 = vrot.slane %v5235_v3, 5  ;;  %v6255_v3 = vld [vmem:[#allocation2 + $0x6c] sm:$0x1] }
  0xa1   :  { %8914 = vmatmul.mubr.f32.vlgmr.msra.gmra.mrb[4].mxu0 %v10174_v62  ;;  %8956 = vmatmul.mubr.f32.vlgmr.msra.gmra.mrb[4].mxu1 %v10174_v62  ;;  %v4183_v62 = vld [vmem:[#allocation2 + $0x8] sm:$0x1] }
  0xa2   :  { %9478 = vmatpush3.bf16.msra.mxu0 %v10059_v6  ;;  %9496 = vmatpush3.bf16.msra.mxu1 %v10065_v9  ;;  %v4199_v30 = vmax.f32 %v4183_v62, %v4191_v63  ;;  %v5220_v63 = vld [vmem:[#allocation2 + $0x4a] sm:$0x1] }
  0xa3   :  { %8920 = vmatprep.mubr.msk.f32.mxu0 %vm9901_vm0, %v9902_v4  ;;  %9479 = vmatprep.subr.bf16.mxu0 %v9900_v1 }
  0xa4   :  { %8962 = vmatprep.mubr.msk.f32.mxu1 %vm9901_vm0, %v9902_v4  ;;  %9497 = vmatprep.subr.bf16.mxu1 %v9900_v1  ;;  %v4216_v55 = vsel %vm75_vm1, %v4215_v31, %v4199_v30  ;;  %v5229_v30 = vld [vmem:[#allocation2 + $0x5b] sm:$0x1]  ;;  %v5236_v31 = vmax.f32 %v5220_v63, %v5228_v0 }
  0xa6   :  { %v5254_v56 = vrot.slane %v5236_v31, 4  ;;  %v6256_v31 = vld [vmem:[#allocation2 + $0x7c] sm:$0x1] }
  0xa9   :  { %8921 = vmatmul.mubr.f32.vlgmr.msra.gmra.mrb[4].mxu0 %v10158_v60  ;;  %8963 = vmatmul.mubr.f32.vlgmr.msra.gmra.mrb[4].mxu1 %v10158_v60 }
  0xaa   :  { %9481 = vmatpush3.bf16.msk.msra.mxu0 %vm9941_vm6, %v9903_v13  ;;  %9499 = vmatpush3.bf16.msk.msra.mxu1 %vm9951_vm9, %v9903_v13 }
  0xab   :  { %8927 = vmatprep.mubr.msk.f32.mxu0 %vm9901_vm0, %v9902_v4  ;;  %8969 = vmatprep.mubr.msk.f32.mxu1 %vm9901_vm0, %v9902_v4 }
  0xac   :  { %9500 = vmatprep.subr.bf16.mxu0 %v9900_v1  ;;  %9518 = vmatprep.subr.bf16.mxu1 %v9900_v1 }
  0xb1   :  { %8928 = vmatmul.mubr.f32.vlgmr.msra.gmra.mrb[4].mxu0 %v10158_v60  ;;  %8970 = vmatmul.mubr.f32.vlgmr.msra.gmra.mrb[4].mxu1 %v10158_v60  ;;  %v4217_v60 = vrot.slane %v4201_v5, 6 }
  0xb2   :  { %9502 = vmatpush3.bf16.msk.msra.mxu0 %vm9941_vm6, %v9903_v13  ;;  %9520 = vmatpush3.bf16.msk.msra.mxu1 %vm9951_vm9, %v9903_v13 }
  0xb3   :  { %8976 = vmatprep.mubr.msk.f32.mxu0 %vm9901_vm0, %v9902_v4  ;;  %9503 = vmatprep.subr.bf16.mxu0 %v9900_v1  ;;  %v4218_v15 = vsel %vm78_vm2, %v4217_v60, %v4216_v55  ;;  %v5230_v60 = vld [vmem:[#allocation2 + $0x6b] sm:$0x1] }
  0xb4   :  { %9018 = vmatprep.mubr.msk.f32.mxu1 %vm9901_vm0, %v9902_v4  ;;  %9521 = vmatprep.subr.bf16.mxu1 %v9900_v1  ;;  %v4220_v20 = vsel %vm81_vm5, %v4219_v14, %v4218_v15  ;;  %v5231_v14 = vld [vmem:[#allocation2 + $0x7b] sm:$0x1]  ;;  %v5238_v15 = vmax.f32 %v5222_v53, %v5230_v60 }
  0xb5   :  { %8977 = vmatmul.mubr.f32.vlgmr.msra.gmra.mrb[6].mxu0 %v3269_v10  ;;  %9019 = vmatmul.mubr.f32.vlgmr.msra.gmra.mrb[6].mxu1 %v3269_v10  ;;  %v4222_v7 = vsel %vm84_vm10, %v4221_v19, %v4220_v20  ;;  %v5221_v10 = vld [vmem:[#allocation2 + $0x5a] sm:$0x1]  ;;  %v5239_v18 = vmax.f32 %v5223_v12, %v5231_v14 }
  0xb6   :  { %9505 = vmatpush3.bf16.msra.mxu0 %v10004_v28  ;;  %9523 = vmatpush3.bf16.msra.mxu1 %v10006_v29  ;;  %v4224_v27 = vsel %vm87_vm11, %v4223_v24, %v4222_v7  ;;  %v5237_v55 = vmax.f32 %v5221_v10, %v5229_v30  ;;  %v5258_v19 = vrot.slane %v5238_v15, 2 }
  0xb7   :  { %8983 = vmatprep.mubr.msk.f32.mxu0 %vm9901_vm0, %v9902_v4  ;;  %9506 = vmatprep.subr.bf16.mxu0 %v9900_v1  ;;  %v4226_v33 = vsel %vm90_vm12, %v4225_v26, %v4224_v27  ;;  %v5260_v21 = vrot.slane %v5239_v18, 1  ;;  %v6250_v27 = vld [vmem:[#allocation2 + $0x1c] sm:$0x1] }
  0xb8   :  { %9025 = vmatprep.mubr.msk.f32.mxu1 %vm9901_vm0, %v9902_v4  ;;  %9524 = vmatprep.subr.bf16.mxu1 %v9900_v1  ;;  %v4228_v34 = vsel %vm93_vm13, %v4227_v32, %v4226_v33  ;;  %v5256_v16 = vrot.slane %v5237_v55, 3  ;;  %v6258_v32 = vld [vmem:[#allocation2 + $0x1d] sm:$0x1]  ;;  %v6251_v33 = vld [vmem:[#allocation2 + $0x2c] sm:$0x1] }
  0xb9   :  { %v4229_v35 = vsel %vm95_vm14, %v4228_v34, 0  ;;  %v6259_v34 = vld [vmem:[#allocation2 + $0x2d] sm:$0x1] }
  0xba   :  { %v10334_v36 = vand.u32 4294901760, %v4229_v35  ;;  %v6267_v43 = vmax.f32 %v6251_v33, %v6259_v34  ;;  %v7291_v33 = vld [vmem:[#allocation2 + $0x1f] sm:$0x1] }
  0xbc   :  { %v10345_v37 = vsub.f32 %v4229_v35, %v10334_v36  ;;  %v6266_v35 = vmax.f32 %v6250_v27, %v6258_v32 }
  0xbd   :  { %8984 = vmatmul.mubr.f32.vlgmr.msra.gmra.mrb[6].mxu0 %v10246_v45  ;;  %9026 = vmatmul.mubr.f32.vlgmr.msra.gmra.mrb[6].mxu1 %v10246_v45 }
  0xbe   :  { %9508 = vmatpush3.bf16.msra.mxu0 %v10020_v48  ;;  %9526 = vmatpush3.bf16.msra.mxu1 %v10024_v49  ;;  %v10350_v39 = vand.u32 4294901760, %v10345_v37 }
  0xbf   :  { %8990 = vmatprep.mubr.msk.f32.mxu0 %vm9901_vm0, %v9902_v4  ;;  %9509 = vmatprep.subr.bf16.mxu0 %v9900_v1 }
  0xc0   :  { %9032 = vmatprep.mubr.msk.f32.mxu1 %vm9901_vm0, %v9902_v4  ;;  %9527 = vmatprep.subr.bf16.mxu1 %v9900_v1  ;;  %v4301_v42 = vsub.f32 %v10345_v37, %v10350_v39 }
  0xc2   :  { %v4302_v59 = vand.u32 4294901760, %v4301_v42  ;;  %v6260_v42 = vld [vmem:[#allocation2 + $0x3d] sm:$0x1] }
  0xc5   :  { %8991 = vmatmul.mubr.f32.vlgmr.msra.gmra.mrb[6].mxu0 %v10257_v47  ;;  %9033 = vmatmul.mubr.f32.vlgmr.msra.gmra.mrb[6].mxu1 %v10257_v47  ;;  %v5233_v47 = vmax.f32 %v5217_v40, %v5225_v41  ;;  %v6257_v40 = vld [vmem:[#allocation2 + $0xd] sm:$0x1]  ;;  %v6252_v41 = vld [vmem:[#allocation2 + $0x3c] sm:$0x1] }
  0xc6   :  { %9511 = vmatpush3.bf16.msk.msra.mxu0 %vm9941_vm6, %v9903_v13  ;;  %9529 = vmatpush3.bf16.msk.msra.mxu1 %vm9951_vm9, %v9903_v13  ;;  %v6268_v54 = vmax.f32 %v6252_v41, %v6260_v42 }
  0xc7   :  { %8997 = vmatprep.mubr.msk.f32.mxu0 %vm9901_vm0, %v9902_v4  ;;  %9512 = vmatprep.subr.bf16.mxu0 %v9900_v1  ;;  %v5248_v62 = vrot.slane %v5233_v47, 7  ;;  %v6281_v47 = vrot.slane %v6266_v35, 7 }
  0xc8   :  { %9039 = vmatprep.mubr.msk.f32.mxu1 %vm9901_vm0, %v9902_v4  ;;  %9530 = vmatprep.subr.bf16.mxu1 %v9900_v1  ;;  %v6285_v63 = vrot.slane %v6268_v54, 5 }
  0xcd   :  { %8998 = vmatmul.mubr.f32.vlgmr.msra.gmra.mrb[6].mxu0 %v10262_v50  ;;  %9040 = vmatmul.mubr.f32.vlgmr.msra.gmra.mrb[6].mxu1 %v10262_v50  ;;  %v5216_v50 = vld [vmem:[#allocation2 + $0xa] sm:$0x1] }
  0xce   :  { %9514 = vmatpush3.bf16.msra.mxu0 %v10059_v6  ;;  %9532 = vmatpush3.bf16.msra.mxu1 %v10065_v9  ;;  %v5232_v61 = vmax.f32 %v5216_v50, %v5224_v51  ;;  %v6253_v51 = vld [vmem:[#allocation2 + $0x4c] sm:$0x1] }
  0xcf   :  { %9004 = vmatprep.mubr.msk.f32.mxu0 %vm9901_vm0, %v9902_v4  ;;  %9515 = vmatprep.subr.bf16.mxu0 %v9900_v1 }
  0xd0   :  { %9046 = vmatprep.mubr.msk.f32.mxu1 %vm9901_vm0, %v9902_v4  ;;  %9533 = vmatprep.subr.bf16.mxu1 %v9900_v1  ;;  %v5249_v5 = vsel %vm75_vm1, %v5248_v62, %v5232_v61  ;;  %v6262_v61 = vld [vmem:[#allocation2 + $0x5d] sm:$0x1]  ;;  %v6269_v62 = vmax.f32 %v6253_v51, %v6261_v52 }
  0xd2   :  { %v6287_v10 = vrot.slane %v6269_v62, 4 }
  0xd5   :  { %9005 = vmatmul.mubr.f32.vlgmr.msra.gmra.mrb[6].mxu0 %v10246_v45  ;;  %9047 = vmatmul.mubr.f32.vlgmr.msra.gmra.mrb[6].mxu1 %v10246_v45 }
  0xd6   :  { %9517 = vmatpush3.bf16.msk.msra.mxu0 %vm9941_vm6, %v9903_v13  ;;  %9535 = vmatpush3.bf16.msk.msra.mxu1 %vm9951_vm9, %v9903_v13 }
  0xd7   :  { %9011 = vmatprep.mubr.msk.f32.mxu0 %vm9901_vm0, %v9902_v4  ;;  %9053 = vmatprep.mubr.msk.f32.mxu1 %vm9901_vm0, %v9902_v4 }
  0xd8   :  { %9536 = vmatprep.subr.bf16.mxu0 %v9900_v1  ;;  %9554 = vmatprep.subr.bf16.mxu1 %v9900_v1 }
  0xdd   :  { %9012 = vmatmul.mubr.f32.vlgmr.msra.gmra.mrb[6].mxu0 %v10246_v45  ;;  %9054 = vmatmul.mubr.f32.vlgmr.msra.gmra.mrb[6].mxu1 %v10246_v45  ;;  %v5250_v45 = vrot.slane %v5234_v58, 6  ;;  %v6283_v58 = vrot.slane %v6267_v43, 6  ;;  %v7282_v43 = vld [vmem:[#allocation2 + $0xe] sm:$0x1] }
  0xde   :  { %9538 = vmatpush3.bf16.msk.msra.mxu0 %vm9941_vm6, %v9903_v13  ;;  %9556 = vmatpush3.bf16.msk.msra.mxu1 %vm9951_vm9, %v9903_v13 }
  0xdf   :  { %9060 = vmatprep.mubr.msk.f32.mxu0 %vm9901_vm0, %v9902_v4  ;;  %9539 = vmatprep.subr.bf16.mxu0 %v9900_v1  ;;  %v5251_v46 = vsel %vm78_vm2, %v5250_v45, %v5249_v5  ;;  %v6263_v45 = vld [vmem:[#allocation2 + $0x6d] sm:$0x1] }
  0xe0   :  { %9102 = vmatprep.mubr.msk.f32.mxu1 %vm9901_vm0, %v9902_v4  ;;  %9557 = vmatprep.subr.bf16.mxu1 %v9900_v1  ;;  %v5253_v57 = vsel %vm81_vm5, %v5252_v38, %v5251_v46  ;;  %v6264_v38 = vld [vmem:[#allocation2 + $0x7d] sm:$0x1]  ;;  %v6271_v46 = vmax.f32 %v6255_v3, %v6263_v45 }
  0xe1   :  { %9061 = vmatmul.mubr.f32.vlgmr.msra.gmra.mrb[8].mxu0 %v4302_v59  ;;  %9103 = vmatmul.mubr.f32.vlgmr.msra.gmra.mrb[8].mxu1 %v4302_v59  ;;  %v5255_v11 = vsel %vm84_vm10, %v5254_v56, %v5253_v57  ;;  %v6254_v59 = vld [vmem:[#allocation2 + $0x5c] sm:$0x1]  ;;  %v6272_v55 = vmax.f32 %v6256_v31, %v6264_v38 }
  0xe2   :  { %9541 = vmatpush3.bf16.msra.mxu0 %v10004_v28  ;;  %9559 = vmatpush3.bf16.msra.mxu1 %v10006_v29  ;;  %v5257_v20 = vsel %vm87_vm11, %v5256_v16, %v5255_v11  ;;  %v6270_v5 = vmax.f32 %v6254_v59, %v6262_v61  ;;  %v6291_v56 = vrot.slane %v6271_v46, 2  ;;  %v9904_v11 = vmov 1966171168   ;;  %v7285_v59 = vld [vmem:[#allocation2 + $0x3e] sm:$0x1] }
  0xe3   :  { %9067 = vmatprep.mubr.msk.f32.mxu0 %vm9901_vm0, %v9902_v4  ;;  %9542 = vmatprep.subr.bf16.mxu0 %v9900_v1  ;;  %v5259_v22 = vsel %vm90_vm12, %v5258_v19, %v5257_v20  ;;  %v6293_v12 = vrot.slane %v6272_v55, 1  ;;  %v1020_v18 = vunpack.c.l.s4 %v9904_v11  ;;  %v7293_v61 = vld [vmem:[#allocation2 + $0x3f] sm:$0x1] }
  0xe4   :  { %9109 = vmatprep.mubr.msk.f32.mxu1 %vm9901_vm0, %v9902_v4  ;;  %9560 = vmatprep.subr.bf16.mxu1 %v9900_v1  ;;  %v5261_v23 = vsel %vm93_vm13, %v5260_v21, %v5259_v22  ;;  %v6289_v53 = vrot.slane %v6270_v5, 3  ;;  %v7301_v31 = vmax.f32 %v7285_v59, %v7293_v61 }
  0xe5   :  { %v5262_v24 = vsel %vm95_vm14, %v5261_v23, 0  ;;  %v1021_v20 = vunpack.c.0.s8 %v1020_v18  ;;  %v7289_v18 = vld [vmem:[#allocation2 + $0x7e] sm:$0x1] }
  0xe6   :  { %v10422_v7 = vand.u32 4294901760, %v5262_v24 }
  0xe7   :  { %v10524_v22 = vsub.s32 %v1021_v20, %v9933_v2  ;;  %v7283_v2 = vld [vmem:[#allocation2 + $0x1e] sm:$0x1]  ;;  %v7297_v20 = vld [vmem:[#allocation2 + $0x7f] sm:$0x1] }
  0xe8   :  { %v10433_v25 = vsub.f32 %v5262_v24, %v10422_v7 }
  0xe9   :  { %9068 = vmatmul.mubr.f32.vlgmr.msra.gmra.mrb[8].mxu0 %v10334_v36  ;;  %9110 = vmatmul.mubr.f32.vlgmr.msra.gmra.mrb[8].mxu1 %v10334_v36 }
  0xea   :  { %9544 = vmatpush3.bf16.msra.mxu0 %v10020_v48  ;;  %9562 = vmatpush3.bf16.msra.mxu1 %v10024_v49  ;;  %v10438_v26 = vand.u32 4294901760, %v10433_v25 }
  0xeb   :  { %9074 = vmatprep.mubr.msk.f32.mxu0 %vm9901_vm0, %v9902_v4  ;;  %9545 = vmatprep.subr.bf16.mxu0 %v9900_v1 }
  0xec   :  { %9116 = vmatprep.mubr.msk.f32.mxu1 %vm9901_vm0, %v9902_v4  ;;  %9563 = vmatprep.subr.bf16.mxu1 %v9900_v1 }
  0xf1   :  { %9075 = vmatmul.mubr.f32.vlgmr.msra.gmra.mrb[8].mxu0 %v10345_v37  ;;  %9117 = vmatmul.mubr.f32.vlgmr.msra.gmra.mrb[8].mxu1 %v10345_v37  ;;  %v5334_v37 = vsub.f32 %v10433_v25, %v10438_v26 }
  0xf2   :  { %9547 = vmatpush3.bf16.msk.msra.mxu0 %vm9941_vm6, %v9903_v13  ;;  %9565 = vmatpush3.bf16.msk.msra.mxu1 %vm9951_vm9, %v9903_v13 }
  0xf3   :  { %9081 = vmatprep.mubr.msk.f32.mxu0 %vm9901_vm0, %v9902_v4  ;;  %9548 = vmatprep.subr.bf16.mxu0 %v9900_v1  ;;  %v5335_v50 = vand.u32 4294901760, %v5334_v37 }
  0xf4   :  { %9123 = vmatprep.mubr.msk.f32.mxu1 %vm9901_vm0, %v9902_v4  ;;  %9566 = vmatprep.subr.bf16.mxu1 %v9900_v1 }
  0xf9   :  { %9082 = vmatmul.mubr.f32.vlgmr.msra.gmra.mrb[8].mxu0 %v10350_v39  ;;  %9124 = vmatmul.mubr.f32.vlgmr.msra.gmra.mrb[8].mxu1 %v10350_v39  ;;  %v6249_v39 = vld [vmem:[#allocation2 + $0xc] sm:$0x1] }
  0xfa   :  { %9550 = vmatpush3.bf16.msra.mxu0 %v10059_v6  ;;  %9568 = vmatpush3.bf16.msra.mxu1 %v10065_v9  ;;  %v6265_v44 = vmax.f32 %v6249_v39, %v6257_v40  ;;  %v7284_v39 = vld [vmem:[#allocation2 + $0x2e] sm:$0x1] }
  0xfb   :  { %9088 = vmatprep.mubr.msk.f32.mxu0 %vm9901_vm0, %v9902_v4  ;;  %9551 = vmatprep.subr.bf16.mxu0 %v9900_v1 }
  0xfc   :  { %9130 = vmatprep.mubr.msk.f32.mxu1 %vm9901_vm0, %v9902_v4  ;;  %9569 = vmatprep.subr.bf16.mxu1 %v9900_v1 }
 0x101   :  { %9089 = vmatmul.mubr.f32.vlgmr.msra.gmra.mrb[8].mxu0 %v10334_v36  ;;  %9131 = vmatmul.mubr.f32.vlgmr.msra.gmra.mrb[8].mxu1 %v10334_v36 }
 0x102   :  { %9553 = vmatpush3.bf16.msk.msra.mxu0 %vm9941_vm6, %v9903_v13  ;;  %9571 = vmatpush3.bf16.msk.msra.mxu1 %vm9951_vm9, %v9903_v13 }
 0x103   :  { %9095 = vmatprep.mubr.msk.f32.mxu0 %vm9901_vm0, %v9902_v4  ;;  %9137 = vmatprep.mubr.msk.f32.mxu1 %vm9901_vm0, %v9902_v4 }
 0x104   :  { %9572 = vmatprep.subr.bf16.mxu0 %v9900_v1  ;;  %9590 = vmatprep.subr.bf16.mxu1 %v9900_v1 }
 0x109   :  { %9096 = vmatmul.mubr.f32.vlgmr.msra.gmra.mrb[8].mxu0 %v10334_v36  ;;  %9138 = vmatmul.mubr.f32.vlgmr.msra.gmra.mrb[8].mxu1 %v10334_v36  ;;  %v6282_v36 = vsel %vm75_vm1, %v6281_v47, %v6265_v44  ;;  %v7290_v44 = vld [vmem:[#allocation2 + $0xf] sm:$0x1] }
 0x10a   :  { %9574 = vmatpush3.bf16.msk.msra.mxu0 %vm9941_vm6, %v9903_v13  ;;  %9592 = vmatpush3.bf16.msk.msra.mxu1 %vm9951_vm9, %v9903_v13  ;;  %v6284_v0 = vsel %vm78_vm2, %v6283_v58, %v6282_v36  ;;  %v7292_v47 = vld [vmem:[#allocation2 + $0x2f] sm:$0x1]  ;;  %v7298_v62 = vmax.f32 %v7282_v43, %v7290_v44 }
 0x10b   :  { %9144 = vmatprep.mubr.msk.f32.mxu0 %vm9901_vm0, %v9902_v4  ;;  %9575 = vmatprep.subr.bf16.mxu0 %v9900_v1  ;;  %v6286_v30 = vsel %vm81_vm5, %v6285_v63, %v6284_v0  ;;  %v7300_v63 = vmax.f32 %v7284_v39, %v7292_v47 }
 0x10c   :  { %9186 = vmatprep.mubr.msk.f32.mxu1 %vm9901_vm0, %v9902_v4  ;;  %9593 = vmatprep.subr.bf16.mxu1 %v9900_v1  ;;  %v6288_v60 = vsel %vm84_vm10, %v6287_v10, %v6286_v30  ;;  %v7294_v30 = vld [vmem:[#allocation2 + $0x4f] sm:$0x1] }
 0x10d   :  { %9145 = vmatmul.mubr.f32.vlgmr.msra.gmra.mrb[10].mxu0 %v5335_v50  ;;  %9187 = vmatmul.mubr.f32.vlgmr.msra.gmra.mrb[10].mxu1 %v5335_v50  ;;  %v6290_v57 = vsel %vm87_vm11, %v6289_v53, %v6288_v60  ;;  %v7299_v50 = vmax.f32 %v7283_v2, %v7291_v33  ;;  %v7316_v38 = vrot.slane %v7300_v63, 6  ;;  %v7287_v53 = vld [vmem:[#allocation2 + $0x5e] sm:$0x1]  ;;  %v7295_v60 = vld [vmem:[#allocation2 + $0x5f] sm:$0x1] }
 0x10e   :  { %9577 = vmatpush3.bf16.msra.mxu0 %v10004_v28  ;;  %9595 = vmatpush3.bf16.msra.mxu1 %v10006_v29  ;;  %v6292_v14 = vsel %vm90_vm12, %v6291_v56, %v6290_v57  ;;  %v7318_v56 = vrot.slane %v7301_v31, 5 }
 0x10f   :  { %9151 = vmatprep.mubr.msk.f32.mxu0 %vm9901_vm0, %v9902_v4  ;;  %9578 = vmatprep.subr.bf16.mxu0 %v9900_v1  ;;  %v6294_v15 = vsel %vm93_vm13, %v6293_v12, %v6292_v14  ;;  %v7314_v5 = vrot.slane %v7299_v50, 7  ;;  %v7288_v12 = vld [vmem:[#allocation2 + $0x6e] sm:$0x1]  ;;  %v7296_v14 = vld [vmem:[#allocation2 + $0x6f] sm:$0x1] }
 0x110   :  { %9193 = vmatprep.mubr.msk.f32.mxu1 %vm9901_vm0, %v9902_v4  ;;  %9596 = vmatprep.subr.bf16.mxu1 %v9900_v1  ;;  %v6295_v16 = vsel %vm95_vm14, %v6294_v15, 0  ;;  %v7303_v15 = vmax.f32 %v7287_v53, %v7295_v60 }
 0x111   :  { %v10508_v19 = vand.u32 4294901760, %v6295_v16  ;;  %v7315_v46 = vsel %vm75_vm1, %v7314_v5, %v7298_v62 }
 0x112   :  { %v7317_v57 = vsel %vm78_vm2, %v7316_v38, %v7315_v46 }
 0x113   :  { %v10521_v21 = vsub.f32 %v6295_v16, %v10508_v19  ;;  %v7319_v11 = vsel %vm81_vm5, %v7318_v56, %v7317_v57 }
 0x115   :  { %9152 = vmatmul.mubr.f32.vlgmr.msra.gmra.mrb[10].mxu0 %v10422_v7  ;;  %9194 = vmatmul.mubr.f32.vlgmr.msra.gmra.mrb[10].mxu1 %v10422_v7 }
 0x116   :  { %9580 = vmatpush3.bf16.msra.mxu0 %v10020_v48  ;;  %9598 = vmatpush3.bf16.msra.mxu1 %v10024_v49 }
 0x117   :  { %9158 = vmatprep.mubr.msk.f32.mxu0 %vm9901_vm0, %v9902_v4  ;;  %9581 = vmatprep.subr.bf16.mxu0 %v9900_v1 }
 0x118   :  { %9200 = vmatprep.mubr.msk.f32.mxu1 %vm9901_vm0, %v9902_v4  ;;  %9599 = vmatprep.subr.bf16.mxu1 %v9900_v1 }
 0x11d   :  { %9159 = vmatmul.mubr.f32.vlgmr.msra.gmra.mrb[10].mxu0 %v10433_v25  ;;  %9201 = vmatmul.mubr.f32.vlgmr.msra.gmra.mrb[10].mxu1 %v10433_v25  ;;  %v10527_v25 = vand.u32 4294901760, %v10521_v21 }
 0x11e   :  { %9583 = vmatpush3.bf16.msk.msra.mxu0 %vm9941_vm6, %v9903_v13  ;;  %9601 = vmatpush3.bf16.msk.msra.mxu1 %vm9951_vm9, %v9903_v13 }
 0x11f   :  { %9165 = vmatprep.mubr.msk.f32.mxu0 %vm9901_vm0, %v9902_v4  ;;  %9584 = vmatprep.subr.bf16.mxu0 %v9900_v1  ;;  %v6367_v37 = vsub.f32 %v10521_v21, %v10527_v25 }
 0x120   :  { %9207 = vmatprep.mubr.msk.f32.mxu1 %vm9901_vm0, %v9902_v4  ;;  %9602 = vmatprep.subr.bf16.mxu1 %v9900_v1 }
 0x121   :  { %v6368_v36 = vand.u32 4294901760, %v6367_v37 }
 0x125   :  { %9166 = vmatmul.mubr.f32.vlgmr.msra.gmra.mrb[10].mxu0 %v10438_v26  ;;  %9208 = vmatmul.mubr.f32.vlgmr.msra.gmra.mrb[10].mxu1 %v10438_v26 }
 0x126   :  { %9586 = vmatpush3.bf16.msra.mxu0 %v10059_v6  ;;  %9604 = vmatpush3.bf16.msra.mxu1 %v10065_v9 }
 0x127   :  { %9172 = vmatprep.mubr.msk.f32.mxu0 %vm9901_vm0, %v9902_v4  ;;  %9587 = vmatprep.subr.bf16.mxu0 %v9900_v1 }
 0x128   :  { %9214 = vmatprep.mubr.msk.f32.mxu1 %vm9901_vm0, %v9902_v4  ;;  %9605 = vmatprep.subr.bf16.mxu1 %v9900_v1 }
 0x12c   :  { %v553_v23 = vpop.f32.mrb[0].mxu0  ;;  %v1012_v24 = vpop.f32.mrb[0].mxu1 }
 0x12d   :  { %v1016_v26 = vmax.f32 %v553_v23, %v1012_v24  ;;  %v8761_v27 = vpop.f32.mrb[1].mxu0  ;;  %v8803_v32 = vpop.f32.mrb[1].mxu1  ;;  %9173 = vmatmul.mubr.f32.vlgmr.msra.gmra.mrb[10].mxu0 %v10422_v7  ;;  %9215 = vmatmul.mubr.f32.vlgmr.msra.gmra.mrb[10].mxu1 %v10422_v7  ;;  %v7304_v23 = vmax.f32 %v7288_v12, %v7296_v14  ;;  %v7322_v24 = vrot.slane %v7303_v15, 3 }
 0x12e   :  { %9589 = vmatpush3.bf16.msk.msra.mxu0 %vm9941_vm6, %v9903_v13  ;;  %9607 = vmatpush3.bf16.msk.msra.mxu1 %vm9951_vm9, %v9903_v13  ;;  %v7305_v27 = vmax.f32 %v7289_v18, %v7297_v20 }
 0x12f   :  { %v1018_v34 = vcombine.high %v1016_v26, %v1016_v26  ;;  %v1025_v35 = vrot.slane %v1016_v26, %v10524_v22  ;;  %9179 = vmatprep.mubr.msk.f32.mxu0 %vm9901_vm0, %v9902_v4  ;;  %9221 = vmatprep.mubr.msk.f32.mxu1 %vm9901_vm0, %v9902_v4  ;;  %v7324_v32 = vrot.slane %v7304_v23, 2 }
 0x130   :  { %9608 = vmatprep.subr.bf16.mxu0 %v9900_v1  ;;  %9626 = vmatprep.subr.bf16.mxu1 %v9900_v1  ;;  %v7326_v33 = vrot.slane %v7305_v27, 1 }
 0x131   :  { %v1032_v40 = vrot.slane %v1018_v34, %v10524_v22  ;;  %v1033_v41 = vcombine.high %v1025_v35, %v1025_v35  ;;  %v1041_v42 = vrot.slane %v1025_v35, %v10524_v22 }
 0x133   :  { %v1034_v51 = vcombine.high %v1032_v40, %v1032_v40  ;;  %v1048_v52 = vrot.slane %v1032_v40, %v10524_v22  ;;  %v1055_v54 = vrot.slane %v1033_v41, %v10524_v22  ;;  %v1063_v58 = vcombine.high %v1041_v42, %v1041_v42  ;;  %1076 = vst.msk [vmem:[#allocation5] sm:$0x1] %vm1075_vm15, %v1041_v42 }
 0x135   :  { %v1062_v0 = vrot.slane %v1034_v51, %v10524_v22  ;;  %v1064_v3 = vcombine.high %v1048_v52, %v1048_v52  ;;  %v1065_v45 = vcombine.high %v1055_v54, %v1055_v54  ;;  %1077 = vst.msk [vmem:[#allocation5 + $0x8] sm:$0x1] %vm1075_vm15, %v1055_v54  ;;  %1078 = vst.msk [vmem:[#allocation5 + $0x10] sm:$0x1] %vm1075_vm15, %v1063_v58  ;;  %9180 = vmatmul.mubr.f32.vlgmr.msra.gmra.mrb[10].mxu0 %v10422_v7 }
 0x136   :  { %1080 = vst.msk [vmem:[#allocation5 + $0x20] sm:$0x1] %vm1075_vm15, %v1048_v52  ;;  %9222 = vmatmul.mubr.f32.vlgmr.msra.gmra.mrb[10].mxu1 %v10422_v7  ;;  %9610 = vmatpush3.bf16.msk.msra.mxu0 %vm9941_vm6, %v9903_v13  ;;  %v7286_v7 = vld [vmem:[#allocation2 + $0x4e] sm:$0x1] }
 0x137   :  { %9628 = vmatpush3.bf16.msk.msra.mxu1 %vm9951_vm9, %v9903_v13  ;;  %v1066_v10 = vcombine.high %v1062_v0, %v1062_v0  ;;  %1079 = vst.msk [vmem:[#allocation5 + $0x18] sm:$0x1] %vm1075_vm15, %v1065_v45  ;;  %1081 = vst.msk [vmem:[#allocation5 + $0x28] sm:$0x1] %vm1075_vm15, %v1062_v0  ;;  %9228 = vmatprep.mubr.msk.f32.mxu0 %vm9901_vm0, %v9902_v4  ;;  %v7302_v55 = vmax.f32 %v7286_v7, %v7294_v30 }
 0x138   :  { %1082 = vst.msk [vmem:[#allocation5 + $0x30] sm:$0x1] %vm1075_vm15, %v1064_v3  ;;  %9611 = vmatprep.subr.bf16.mxu0 %v9900_v1  ;;  %9270 = vmatprep.mubr.msk.f32.mxu1 %vm9901_vm0, %v9902_v4 }
 0x139   :  { %9629 = vmatprep.subr.bf16.mxu1 %v9900_v1  ;;  %1083 = vst.msk [vmem:[#allocation5 + $0x38] sm:$0x1] %vm1075_vm15, %v1066_v10  ;;  %9229 = vmatmul.mubr.f32.vlgmr.msra.gmra.mrb[12].mxu0 %v6368_v36  ;;  %v7320_v16 = vrot.slane %v7302_v55, 4 }
 0x13a   :  { %9271 = vmatmul.mubr.f32.vlgmr.msra.gmra.mrb[12].mxu1 %v6368_v36  ;;  %9613 = vmatpush3.bf16.msra.mxu0 %v10004_v28 }
 0x13b   :  { %9631 = vmatpush3.bf16.msra.mxu1 %v10006_v29  ;;  %9235 = vmatprep.mubr.msk.f32.mxu0 %vm9901_vm0, %v9902_v4  ;;  %v7321_v26 = vsel %vm84_vm10, %v7320_v16, %v7319_v11 }
 0x13c   :  { %9614 = vmatprep.subr.bf16.mxu0 %v9900_v1  ;;  %9277 = vmatprep.mubr.msk.f32.mxu1 %vm9901_vm0, %v9902_v4  ;;  %v7323_v2 = vsel %vm87_vm11, %v7322_v24, %v7321_v26 }
 0x13d   :  { %9632 = vmatprep.subr.bf16.mxu1 %v9900_v1  ;;  %v7325_v34 = vsel %vm90_vm12, %v7324_v32, %v7323_v2 }
 0x13e   :  { %v7327_v35 = vsel %vm93_vm13, %v7326_v33, %v7325_v34 }
 0x141   :  { %9236 = vmatmul.mubr.f32.vlgmr.msra.gmra.mrb[12].mxu0 %v10508_v19 }
 0x142   :  { %9278 = vmatmul.mubr.f32.vlgmr.msra.gmra.mrb[12].mxu1 %v10508_v19  ;;  %9616 = vmatpush3.bf16.msra.mxu0 %v10020_v48 }
 0x143   :  { %9634 = vmatpush3.bf16.msra.mxu1 %v10024_v49  ;;  %9242 = vmatprep.mubr.msk.f32.mxu0 %vm9901_vm0, %v9902_v4 }
 0x144   :  { %9617 = vmatprep.subr.bf16.mxu0 %v9900_v1  ;;  %9284 = vmatprep.mubr.msk.f32.mxu1 %vm9901_vm0, %v9902_v4 }
 0x145   :  { %9635 = vmatprep.subr.bf16.mxu1 %v9900_v1 }
 0x149   :  { %9243 = vmatmul.mubr.f32.vlgmr.msra.gmra.mrb[12].mxu0 %v10521_v21 }
 0x14a   :  { %9285 = vmatmul.mubr.f32.vlgmr.msra.gmra.mrb[12].mxu1 %v10521_v21  ;;  %9619 = vmatpush3.bf16.msk.msra.mxu0 %vm9941_vm6, %v9903_v13  ;;  %v7328_v21 = vsel %vm95_vm14, %v7327_v35, 0 }
 0x14b   :  { %9637 = vmatpush3.bf16.msk.msra.mxu1 %vm9951_vm9, %v9903_v13  ;;  %9249 = vmatprep.mubr.msk.f32.mxu0 %vm9901_vm0, %v9902_v4  ;;  %v10615_v37 = vand.u32 4294901760, %v7328_v21 }
 0x14c   :  { %9620 = vmatprep.subr.bf16.mxu0 %v9900_v1  ;;  %9291 = vmatprep.mubr.msk.f32.mxu1 %vm9901_vm0, %v9902_v4 }
 0x14d   :  { %9638 = vmatprep.subr.bf16.mxu1 %v9900_v1  ;;  %v7398_v39 = vsub.f32 %v7328_v21, %v10615_v37 }
 0x14f   :  { %v7399_v44 = vand.u32 4294901760, %v7398_v39 }
 0x151   :  { %9250 = vmatmul.mubr.f32.vlgmr.msra.gmra.mrb[12].mxu0 %v10527_v25  ;;  %v7400_v58 = vsub.f32 %v7398_v39, %v7399_v44 }
 0x152   :  { %9292 = vmatmul.mubr.f32.vlgmr.msra.gmra.mrb[12].mxu1 %v10527_v25  ;;  %9622 = vmatpush3.bf16.msra.mxu0 %v10059_v6 }
 0x153   :  { %9640 = vmatpush3.bf16.msra.mxu1 %v10065_v9  ;;  %9256 = vmatprep.mubr.msk.f32.mxu0 %vm9901_vm0, %v9902_v4  ;;  %v7401_v45 = vand.u32 4294901760, %v7400_v58 }
 0x154   :  { %9623 = vmatprep.subr.bf16.mxu0 %v9900_v1  ;;  %9298 = vmatprep.mubr.msk.f32.mxu1 %vm9901_vm0, %v9902_v4 }
 0x155   :  { %9641 = vmatprep.subr.bf16.mxu1 %v9900_v1 }
 0x158   :  { %v1587_v40 = vpop.f32.mrb[2].mxu0  ;;  %v2046_v25 = vpop.f32.mrb[2].mxu1 }
 0x159   :  { %v2050_v41 = vmax.f32 %v1587_v40, %v2046_v25  ;;  %v8845_v42 = vpop.f32.mrb[3].mxu0  ;;  %v8887_v43 = vpop.f32.mrb[3].mxu1  ;;  %9257 = vmatmul.mubr.f32.vlgmr.msra.gmra.mrb[12].mxu0 %v10508_v19 }
 0x15a   :  { %9299 = vmatmul.mubr.f32.vlgmr.msra.gmra.mrb[12].mxu1 %v10508_v19  ;;  %9625 = vmatpush3.bf16.msk.msra.mxu0 %vm9941_vm6, %v9903_v13 }
 0x15b   :  { %9643 = vmatpush3.bf16.msk.msra.mxu1 %vm9951_vm9, %v9903_v13  ;;  %v2052_v47 = vcombine.high %v2050_v41, %v2050_v41  ;;  %v2059_v50 = vrot.slane %v2050_v41, %v10524_v22  ;;  %9263 = vmatprep.mubr.msk.f32.mxu0 %vm9901_vm0, %v9902_v4 }
 0x15c   :  { %9305 = vmatprep.mubr.msk.f32.mxu1 %vm9901_vm0, %v9902_v4  ;;  %9644 = vmatprep.subr.bf16.mxu0 %v9900_v1 }
 0x15d   :  { %9662 = vmatprep.subr.bf16.mxu1 %v9900_v1  ;;  %v2066_v51 = vrot.slane %v2052_v47, %v10524_v22  ;;  %v2067_v52 = vcombine.high %v2059_v50, %v2059_v50  ;;  %v2075_v54 = vrot.slane %v2059_v50, %v10524_v22 }
 0x15f   :  { %v2068_v36 = vcombine.high %v2066_v51, %v2066_v51  ;;  %v2082_v59 = vrot.slane %v2066_v51, %v10524_v22  ;;  %v2089_v61 = vrot.slane %v2067_v52, %v10524_v22  ;;  %v2097_v62 = vcombine.high %v2075_v54, %v2075_v54  ;;  %2109 = vst.msk [vmem:[#allocation5 + $0x1] sm:$0x1] %vm1075_vm15, %v2075_v54 }
 0x161   :  { %v2096_v63 = vrot.slane %v2068_v36, %v10524_v22  ;;  %v2098_v0 = vcombine.high %v2082_v59, %v2082_v59  ;;  %v2099_v3 = vcombine.high %v2089_v61, %v2089_v61  ;;  %2110 = vst.msk [vmem:[#allocation5 + $0x9] sm:$0x1] %vm1075_vm15, %v2089_v61  ;;  %2111 = vst.msk [vmem:[#allocation5 + $0x11] sm:$0x1] %vm1075_vm15, %v2097_v62  ;;  %9264 = vmatmul.mubr.f32.vlgmr.msra.gmra.mrb[12].mxu0 %v10508_v19 }
 0x162   :  { %2113 = vst.msk [vmem:[#allocation5 + $0x21] sm:$0x1] %vm1075_vm15, %v2082_v59  ;;  %9306 = vmatmul.mubr.f32.vlgmr.msra.gmra.mrb[12].mxu1 %v10508_v19  ;;  %9646 = vmatpush3.bf16.msk.msra.mxu0 %vm9941_vm6, %v9903_v13 }
 0x163   :  { %9664 = vmatpush3.bf16.msk.msra.mxu1 %vm9951_vm9, %v9903_v13  ;;  %v2100_v5 = vcombine.high %v2096_v63, %v2096_v63  ;;  %2112 = vst.msk [vmem:[#allocation5 + $0x19] sm:$0x1] %vm1075_vm15, %v2099_v3  ;;  %2114 = vst.msk [vmem:[#allocation5 + $0x29] sm:$0x1] %vm1075_vm15, %v2096_v63  ;;  %9312 = vmatprep.mubr.msk.f32.mxu0 %vm9901_vm0, %v9902_v4 }
 0x164   :  { %2115 = vst.msk [vmem:[#allocation5 + $0x31] sm:$0x1] %vm1075_vm15, %v2098_v0  ;;  %9647 = vmatprep.subr.bf16.mxu0 %v9900_v1  ;;  %9354 = vmatprep.mubr.msk.f32.mxu1 %vm9901_vm0, %v9902_v4 }
 0x165   :  { %9665 = vmatprep.subr.bf16.mxu1 %v9900_v1  ;;  %2116 = vst.msk [vmem:[#allocation5 + $0x39] sm:$0x1] %vm1075_vm15, %v2100_v5  ;;  %9313 = vmatmul.mubr.f32.vlgmr.msra.gmra.mrb[14].mxu0 %v7401_v45 }
 0x166   :  { %9355 = vmatmul.mubr.f32.vlgmr.msra.gmra.mrb[14].mxu1 %v7401_v45  ;;  %9649 = vmatpush3.bf16.msra.mxu0 %v10004_v28 }
 0x167   :  { %9667 = vmatpush3.bf16.msra.mxu1 %v10006_v29  ;;  %9319 = vmatprep.mubr.msk.f32.mxu0 %vm9901_vm0, %v9902_v4 }
 0x168   :  { %9650 = vmatprep.subr.bf16.mxu0 %v9900_v1  ;;  %9361 = vmatprep.mubr.msk.f32.mxu1 %vm9901_vm0, %v9902_v4 }
 0x169   :  { %9668 = vmatprep.subr.bf16.mxu1 %v9900_v1 }
 0x16d   :  { %9320 = vmatmul.mubr.f32.vlgmr.msra.gmra.mrb[14].mxu0 %v10615_v37 }
 0x16e   :  { %9362 = vmatmul.mubr.f32.vlgmr.msra.gmra.mrb[14].mxu1 %v10615_v37  ;;  %9652 = vmatpush3.bf16.msra.mxu0 %v10020_v48 }
 0x16f   :  { %9670 = vmatpush3.bf16.msra.mxu1 %v10024_v49  ;;  %9326 = vmatprep.mubr.msk.f32.mxu0 %vm9901_vm0, %v9902_v4 }
 0x170   :  { %9653 = vmatprep.subr.bf16.mxu0 %v9900_v1  ;;  %9368 = vmatprep.mubr.msk.f32.mxu1 %vm9901_vm0, %v9902_v4 }
 0x171   :  { %9671 = vmatprep.subr.bf16.mxu1 %v9900_v1 }
 0x175   :  { %9327 = vmatmul.mubr.f32.vlgmr.msra.gmra.mrb[14].mxu0 %v7398_v39 }
 0x176   :  { %9369 = vmatmul.mubr.f32.vlgmr.msra.gmra.mrb[14].mxu1 %v7398_v39  ;;  %9655 = vmatpush3.bf16.msk.msra.mxu0 %vm9941_vm6, %v9903_v13 }
 0x177   :  { %9673 = vmatpush3.bf16.msk.msra.mxu1 %vm9951_vm9, %v9903_v13  ;;  %9333 = vmatprep.mubr.msk.f32.mxu0 %vm9901_vm0, %v9902_v4 }
 0x178   :  { %9656 = vmatprep.subr.bf16.mxu0 %v9900_v1  ;;  %9375 = vmatprep.mubr.msk.f32.mxu1 %vm9901_vm0, %v9902_v4 }
 0x179   :  { %9674 = vmatprep.subr.bf16.mxu1 %v9900_v1 }
 0x17d   :  { %9334 = vmatmul.mubr.f32.vlgmr.msra.gmra.mrb[14].mxu0 %v7399_v44 }
 0x17e   :  { %9376 = vmatmul.mubr.f32.vlgmr.msra.gmra.mrb[14].mxu1 %v7399_v44  ;;  %9658 = vmatpush3.bf16.msra.mxu0 %v10059_v6 }
 0x17f   :  { %9676 = vmatpush3.bf16.msra.mxu1 %v10065_v9  ;;  %9340 = vmatprep.mubr.msk.f32.mxu0 %vm9901_vm0, %v9902_v4 }
 0x180   :  { %9659 = vmatprep.subr.bf16.mxu0 %v9900_v1  ;;  %9382 = vmatprep.mubr.msk.f32.mxu1 %vm9901_vm0, %v9902_v4 }
 0x181   :  { %9677 = vmatprep.subr.bf16.mxu1 %v9900_v1 }
 0x184   :  { %v2620_v28 = vpop.f32.mrb[4].mxu0  ;;  %v3079_v29 = vpop.f32.mrb[4].mxu1 }
 0x185   :  { %v3083_v48 = vmax.f32 %v2620_v28, %v3079_v29  ;;  %v8929_v49 = vpop.f32.mrb[5].mxu0  ;;  %v8971_v19 = vpop.f32.mrb[5].mxu1  ;;  %9341 = vmatmul.mubr.f32.vlgmr.msra.gmra.mrb[14].mxu0 %v10615_v37 }
 0x186   :  { %9383 = vmatmul.mubr.f32.vlgmr.msra.gmra.mrb[14].mxu1 %v10615_v37  ;;  %9661 = vmatpush3.bf16.msk.msra.mxu0 %vm9941_vm6, %v9903_v13 }
 0x187   :  { %9679 = vmatpush3.bf16.msk.msra.mxu1 %vm9951_vm9, %v9903_v13  ;;  %v3085_v6 = vcombine.high %v3083_v48, %v3083_v48  ;;  %v3092_v1 = vrot.slane %v3083_v48, %v10524_v22  ;;  %9347 = vmatprep.mubr.msk.f32.mxu0 %vm9901_vm0, %v9902_v4 }
 0x188   :  { %9389 = vmatprep.mubr.msk.f32.mxu1 %vm9901_vm0, %v9902_v4 }
 0x189   :  { %v3099_v9 = vrot.slane %v3085_v6, %v10524_v22  ;;  %v3100_v10 = vcombine.high %v3092_v1, %v3092_v1  ;;  %v3108_v7 = vrot.slane %v3092_v1, %v10524_v22 }
 0x18b   :  { %v3101_v8 = vcombine.high %v3099_v9, %v3099_v9  ;;  %v3115_v30 = vrot.slane %v3099_v9, %v10524_v22  ;;  %v3122_v17 = vrot.slane %v3100_v10, %v10524_v22  ;;  %v3130_v13 = vcombine.high %v3108_v7, %v3108_v7  ;;  %3142 = vst.msk [vmem:[#allocation5 + $0x2] sm:$0x1] %vm1075_vm15, %v3108_v7 }
 0x18d   :  { %v3129_v31 = vrot.slane %v3101_v8, %v10524_v22  ;;  %v3131_v38 = vcombine.high %v3115_v30, %v3115_v30  ;;  %v3132_v46 = vcombine.high %v3122_v17, %v3122_v17  ;;  %3143 = vst.msk [vmem:[#allocation5 + $0xa] sm:$0x1] %vm1075_vm15, %v3122_v17  ;;  %3144 = vst.msk [vmem:[#allocation5 + $0x12] sm:$0x1] %vm1075_vm15, %v3130_v13  ;;  %9348 = vmatmul.mubr.f32.vlgmr.msra.gmra.mrb[14].mxu0 %v10615_v37 }
 0x18e   :  { %3146 = vst.msk [vmem:[#allocation5 + $0x22] sm:$0x1] %vm1075_vm15, %v3115_v30  ;;  %9390 = vmatmul.mubr.f32.vlgmr.msra.gmra.mrb[14].mxu1 %v10615_v37 }
 0x18f   :  { %v3133_v4 = vcombine.high %v3129_v31, %v3129_v31  ;;  %3145 = vst.msk [vmem:[#allocation5 + $0x1a] sm:$0x1] %vm1075_vm15, %v3132_v46  ;;  %3147 = vst.msk [vmem:[#allocation5 + $0x2a] sm:$0x1] %vm1075_vm15, %v3129_v31 }
 0x190   :  { %3148 = vst.msk [vmem:[#allocation5 + $0x32] sm:$0x1] %vm1075_vm15, %v3131_v38 }
 0x191   :  { %3149 = vst.msk [vmem:[#allocation5 + $0x3a] sm:$0x1] %vm1075_vm15, %v3133_v4 }
 0x1b0   :  { %v3653_v53 = vpop.f32.mrb[6].mxu0  ;;  %v4112_v60 = vpop.f32.mrb[6].mxu1 }
 0x1b1   :  { %v4116_v55 = vmax.f32 %v3653_v53, %v4112_v60  ;;  %v9013_v56 = vpop.f32.mrb[7].mxu0  ;;  %v9055_v57 = vpop.f32.mrb[7].mxu1 }
 0x1b3   :  { %v4118_v12 = vcombine.high %v4116_v55, %v4116_v55  ;;  %v4125_v14 = vrot.slane %v4116_v55, %v10524_v22 }
 0x1b5   :  { %v4132_v15 = vrot.slane %v4118_v12, %v10524_v22  ;;  %v4133_v16 = vcombine.high %v4125_v14, %v4125_v14  ;;  %v4141_v11 = vrot.slane %v4125_v14, %v10524_v22 }
 0x1b7   :  { %v4134_v18 = vcombine.high %v4132_v15, %v4132_v15  ;;  %v4148_v20 = vrot.slane %v4132_v15, %v10524_v22  ;;  %v4155_v23 = vrot.slane %v4133_v16, %v10524_v22  ;;  %v4163_v24 = vcombine.high %v4141_v11, %v4141_v11  ;;  %4175 = vst.msk [vmem:[#allocation5 + $0x3] sm:$0x1] %vm1075_vm15, %v4141_v11 }
 0x1b9   :  { %v4162_v26 = vrot.slane %v4134_v18, %v10524_v22  ;;  %v4164_v27 = vcombine.high %v4148_v20, %v4148_v20  ;;  %v4165_v32 = vcombine.high %v4155_v23, %v4155_v23  ;;  %4176 = vst.msk [vmem:[#allocation5 + $0xb] sm:$0x1] %vm1075_vm15, %v4155_v23  ;;  %4177 = vst.msk [vmem:[#allocation5 + $0x13] sm:$0x1] %vm1075_vm15, %v4163_v24 }
 0x1ba   :  { %4179 = vst.msk [vmem:[#allocation5 + $0x23] sm:$0x1] %vm1075_vm15, %v4148_v20 }
 0x1bb   :  { %v4166_v2 = vcombine.high %v4162_v26, %v4162_v26  ;;  %4178 = vst.msk [vmem:[#allocation5 + $0x1b] sm:$0x1] %vm1075_vm15, %v4165_v32  ;;  %4180 = vst.msk [vmem:[#allocation5 + $0x2b] sm:$0x1] %vm1075_vm15, %v4162_v26 }
 0x1bc   :  { %4181 = vst.msk [vmem:[#allocation5 + $0x33] sm:$0x1] %vm1075_vm15, %v4164_v27 }
 0x1bd   :  { %4182 = vst.msk [vmem:[#allocation5 + $0x3b] sm:$0x1] %vm1075_vm15, %v4166_v2 }
 0x1dc   :  { %v4686_v33 = vpop.f32.mrb[8].mxu0  ;;  %v5145_v34 = vpop.f32.mrb[8].mxu1 }
 0x1dd   :  { %v5149_v35 = vmax.f32 %v4686_v33, %v5145_v34  ;;  %v9097_v21 = vpop.f32.mrb[9].mxu0  ;;  %v9139_v37 = vpop.f32.mrb[9].mxu1 }
 0x1df   :  { %v5151_v39 = vcombine.high %v5149_v35, %v5149_v35  ;;  %v5158_v40 = vrot.slane %v5149_v35, %v10524_v22 }
 0x1e1   :  { %v5165_v25 = vrot.slane %v5151_v39, %v10524_v22  ;;  %v5166_v41 = vcombine.high %v5158_v40, %v5158_v40  ;;  %v5174_v42 = vrot.slane %v5158_v40, %v10524_v22 }
 0x1e3   :  { %v5167_v43 = vcombine.high %v5165_v25, %v5165_v25  ;;  %v5181_v44 = vrot.slane %v5165_v25, %v10524_v22  ;;  %v5188_v47 = vrot.slane %v5166_v41, %v10524_v22  ;;  %v5196_v50 = vcombine.high %v5174_v42, %v5174_v42  ;;  %5208 = vst.msk [vmem:[#allocation5 + $0x4] sm:$0x1] %vm1075_vm15, %v5174_v42 }
 0x1e5   :  { %v5195_v51 = vrot.slane %v5167_v43, %v10524_v22  ;;  %v5197_v52 = vcombine.high %v5181_v44, %v5181_v44  ;;  %v5198_v54 = vcombine.high %v5188_v47, %v5188_v47  ;;  %5209 = vst.msk [vmem:[#allocation5 + $0xc] sm:$0x1] %vm1075_vm15, %v5188_v47  ;;  %5210 = vst.msk [vmem:[#allocation5 + $0x14] sm:$0x1] %vm1075_vm15, %v5196_v50 }
 0x1e6   :  { %5212 = vst.msk [vmem:[#allocation5 + $0x24] sm:$0x1] %vm1075_vm15, %v5181_v44 }
 0x1e7   :  { %v5199_v58 = vcombine.high %v5195_v51, %v5195_v51  ;;  %5211 = vst.msk [vmem:[#allocation5 + $0x1c] sm:$0x1] %vm1075_vm15, %v5198_v54  ;;  %5213 = vst.msk [vmem:[#allocation5 + $0x2c] sm:$0x1] %vm1075_vm15, %v5195_v51 }
 0x1e8   :  { %5214 = vst.msk [vmem:[#allocation5 + $0x34] sm:$0x1] %vm1075_vm15, %v5197_v52 }
 0x1e9   :  { %5215 = vst.msk [vmem:[#allocation5 + $0x3c] sm:$0x1] %vm1075_vm15, %v5199_v58 }
 0x208   :  { %v5719_v36 = vpop.f32.mrb[10].mxu0 }
 0x209   :  { %v6178_v59 = vpop.f32.mrb[10].mxu1  ;;  %v9181_v62 = vpop.f32.mrb[11].mxu0 }
 0x20a   :  { %v6182_v61 = vmax.f32 %v5719_v36, %v6178_v59  ;;  %v9223_v63 = vpop.f32.mrb[11].mxu1 }
 0x20c   :  { %v6184_v0 = vcombine.high %v6182_v61, %v6182_v61  ;;  %v6191_v3 = vrot.slane %v6182_v61, %v10524_v22 }
 0x20e   :  { %v6198_v45 = vrot.slane %v6184_v0, %v10524_v22  ;;  %v6199_v5 = vcombine.high %v6191_v3, %v6191_v3  ;;  %v6207_v28 = vrot.slane %v6191_v3, %v10524_v22 }
 0x210   :  { %v6200_v29 = vcombine.high %v6198_v45, %v6198_v45  ;;  %v6214_v48 = vrot.slane %v6198_v45, %v10524_v22  ;;  %v6221_v49 = vrot.slane %v6199_v5, %v10524_v22  ;;  %v6229_v19 = vcombine.high %v6207_v28, %v6207_v28  ;;  %6241 = vst.msk [vmem:[#allocation5 + $0x5] sm:$0x1] %vm1075_vm15, %v6207_v28 }
 0x212   :  { %v6228_v6 = vrot.slane %v6200_v29, %v10524_v22  ;;  %v6230_v1 = vcombine.high %v6214_v48, %v6214_v48  ;;  %v6231_v9 = vcombine.high %v6221_v49, %v6221_v49  ;;  %6242 = vst.msk [vmem:[#allocation5 + $0xd] sm:$0x1] %vm1075_vm15, %v6221_v49  ;;  %6243 = vst.msk [vmem:[#allocation5 + $0x15] sm:$0x1] %vm1075_vm15, %v6229_v19 }
 0x213   :  { %6245 = vst.msk [vmem:[#allocation5 + $0x25] sm:$0x1] %vm1075_vm15, %v6214_v48 }
 0x214   :  { %v6232_v10 = vcombine.high %v6228_v6, %v6228_v6  ;;  %6244 = vst.msk [vmem:[#allocation5 + $0x1d] sm:$0x1] %vm1075_vm15, %v6231_v9  ;;  %6246 = vst.msk [vmem:[#allocation5 + $0x2d] sm:$0x1] %vm1075_vm15, %v6228_v6 }
 0x215   :  { %6247 = vst.msk [vmem:[#allocation5 + $0x35] sm:$0x1] %vm1075_vm15, %v6230_v1 }
 0x216   :  { %6248 = vst.msk [vmem:[#allocation5 + $0x3d] sm:$0x1] %vm1075_vm15, %v6232_v10 }
 0x234   :  { %v6752_v7 = vpop.f32.mrb[12].mxu0 }
 0x235   :  { %v7211_v8 = vpop.f32.mrb[12].mxu1  ;;  %v9265_v17 = vpop.f32.mrb[13].mxu0 }
 0x236   :  { %v7215_v30 = vmax.f32 %v6752_v7, %v7211_v8  ;;  %v9307_v13 = vpop.f32.mrb[13].mxu1 }
 0x238   :  { %v7217_v31 = vcombine.high %v7215_v30, %v7215_v30  ;;  %v7224_v38 = vrot.slane %v7215_v30, %v10524_v22 }
 0x23a   :  { %v7231_v46 = vrot.slane %v7217_v31, %v10524_v22  ;;  %v7232_v4 = vcombine.high %v7224_v38, %v7224_v38  ;;  %v7240_v53 = vrot.slane %v7224_v38, %v10524_v22 }
 0x23c   :  { %v7233_v60 = vcombine.high %v7231_v46, %v7231_v46  ;;  %v7247_v55 = vrot.slane %v7231_v46, %v10524_v22  ;;  %v7254_v56 = vrot.slane %v7232_v4, %v10524_v22  ;;  %v7262_v57 = vcombine.high %v7240_v53, %v7240_v53  ;;  %7274 = vst.msk [vmem:[#allocation5 + $0x6] sm:$0x1] %vm1075_vm15, %v7240_v53 }
 0x23e   :  { %v7261_v12 = vrot.slane %v7233_v60, %v10524_v22  ;;  %v7263_v14 = vcombine.high %v7247_v55, %v7247_v55  ;;  %v7264_v15 = vcombine.high %v7254_v56, %v7254_v56  ;;  %7275 = vst.msk [vmem:[#allocation5 + $0xe] sm:$0x1] %vm1075_vm15, %v7254_v56  ;;  %7276 = vst.msk [vmem:[#allocation5 + $0x16] sm:$0x1] %vm1075_vm15, %v7262_v57 }
 0x23f   :  { %7278 = vst.msk [vmem:[#allocation5 + $0x26] sm:$0x1] %vm1075_vm15, %v7247_v55 }
 0x240   :  { %v7265_v16 = vcombine.high %v7261_v12, %v7261_v12  ;;  %7277 = vst.msk [vmem:[#allocation5 + $0x1e] sm:$0x1] %vm1075_vm15, %v7264_v15  ;;  %7279 = vst.msk [vmem:[#allocation5 + $0x2e] sm:$0x1] %vm1075_vm15, %v7261_v12 }
 0x241   :  { %7280 = vst.msk [vmem:[#allocation5 + $0x36] sm:$0x1] %vm1075_vm15, %v7263_v14 }
 0x242   :  { %7281 = vst.msk [vmem:[#allocation5 + $0x3e] sm:$0x1] %vm1075_vm15, %v7265_v16 }
 0x260   :  { %v7785_v11 = vpop.f32.mrb[14].mxu0 }
 0x261   :  { %v8244_v18 = vpop.f32.mrb[14].mxu1  ;;  %v9349_v23 = vpop.f32.mrb[15].mxu0 }
 0x262   :  { %v8248_v20 = vmax.f32 %v7785_v11, %v8244_v18  ;;  %v9391_v24 = vpop.f32.mrb[15].mxu1 }
 0x264   :  { %v8250_v26 = vcombine.high %v8248_v20, %v8248_v20  ;;  %v8257_v27 = vrot.slane %v8248_v20, %v10524_v22 }
 0x266   :  { %v8264_v32 = vrot.slane %v8250_v26, %v10524_v22  ;;  %v8265_v2 = vcombine.high %v8257_v27, %v8257_v27  ;;  %v8273_v33 = vrot.slane %v8257_v27, %v10524_v22 }
 0x268   :  { %v8266_v34 = vcombine.high %v8264_v32, %v8264_v32  ;;  %v8280_v35 = vrot.slane %v8264_v32, %v10524_v22  ;;  %v8287_v21 = vrot.slane %v8265_v2, %v10524_v22  ;;  %v8295_v37 = vcombine.high %v8273_v33, %v8273_v33  ;;  %8307 = vst.msk [vmem:[#allocation5 + $0x7] sm:$0x1] %vm1075_vm15, %v8273_v33 }
 0x26a   :  { %v8294_v39 = vrot.slane %v8266_v34, %v10524_v22  ;;  %v8296_v40 = vcombine.high %v8280_v35, %v8280_v35  ;;  %v8297_v25 = vcombine.high %v8287_v21, %v8287_v21  ;;  %8308 = vst.msk [vmem:[#allocation5 + $0xf] sm:$0x1] %vm1075_vm15, %v8287_v21  ;;  %8309 = vst.msk [vmem:[#allocation5 + $0x17] sm:$0x1] %vm1075_vm15, %v8295_v37 }
 0x26b   :  { %8311 = vst.msk [vmem:[#allocation5 + $0x27] sm:$0x1] %vm1075_vm15, %v8280_v35 }
 0x26c   :  { %v8298_v41 = vcombine.high %v8294_v39, %v8294_v39  ;;  %8310 = vst.msk [vmem:[#allocation5 + $0x1f] sm:$0x1] %vm1075_vm15, %v8297_v25  ;;  %8312 = vst.msk [vmem:[#allocation5 + $0x2f] sm:$0x1] %vm1075_vm15, %v8294_v39 }
 0x26d   :  { %8313 = vst.msk [vmem:[#allocation5 + $0x37] sm:$0x1] %vm1075_vm15, %v8296_v40 }
 0x26e   :  { %8314 = vst.msk [vmem:[#allocation5 + $0x3f] sm:$0x1] %vm1075_vm15, %v8298_v41 }
 0x26f   :  { %9882 = shalt.err (!%p9879_p12)
}
 0x270   :  { %s9883_s24 = scalar_lea.hbm %s10820_s1, 1024 }
 0x271   :  { %p9884_p13 = scmp.ne.s32.totalorder %s10820_s1, %s9883_s24  ;;  %p9887_p0 = scmp.lt.u32.totalorder %s9883_s24, %s10820_s1 }
 0x273   :  { %p9889_p1 = pnand %p9887_p0, %p9884_p13 }
 0x275   :  { %9892 = shalt.err (!%p9889_p1)
}
 0x276   :  { %8326 = dma.vmem_to_hbm [thread:$0]  %s8321_s20, 1024, %s10820_s1, [#allocation4], %s9898_s16, %s9898_s16, %s9899_s17  }
 0x277   :  { %9895 = dma.done.wait [#allocation4], 1024  }
 0x278   :  { %9896 = vsyncadd [#allocation4], 4294966272 }
 0x279   :  { %8330 = vsyncpa [#allocation3], 1 }
 0x27a   :  { %8331 = vsyncpa [#allocation4], 1 }

</bundles_post_ra>
